<compile_context>
chip_gen: v5e
topology: v5e:2x2
jax: 0.10.0
libtpu: 0.0.40
codegen_flags: <defaults>
</compile_context>

<pallas_src>
import jax
import jax.numpy as jnp
from jax import lax
from jax.experimental import pallas as pl
from jax.experimental.pallas import tpu as pltpu


# ----------------------------- Pallas kernel --------------------------------
def make_detector_kernel(n_conv, K, M_b):
    """Kernel over one batch block (b_blk batch elements folded into lanes).

    Column layout inside a block is neighbour-major:
      column = kk * M_b + local_b * M + m,   M_b = b_blk * M,  S_b = M_b * K
    so each neighbour slab is a contiguous, 128-aligned (rows, M_b) lane slice.
    """

    def kernel(*refs):
        i = 0
        g_ref = refs[i]; i += 1            # (C_g, S_b)  grouped features, bf16, k-major
        kx_ref = refs[i]; i += 1           # (3,   S_b)  knn xyz, f32, k-major
        conv_p = []
        for _ in range(n_conv):
            conv_p.append(refs[i:i + 2]); i += 2      # (W' = s*W  [bf16], shift [f32])
        mlp_p = []
        for _ in range(2):
            mlp_p.append(refs[i:i + 2]); i += 2       # (W' = s*W  [f32], shift' = s*b+h)
        Wm3_ref, bm3_ref = refs[i], refs[i + 1]; i += 2
        ks_ref, af_ref, afm_ref = refs[i:i + 3]

        # ---- shared point-wise conv stack: 1x1 Conv2d(no bias) + folded BN + ReLU ----
        # bf16 operands on the MXU, f32 accumulate (DEFAULT precision).
        x = g_ref[...]                                              # (C_g, S_b) bf16
        for (W_ref, h_ref) in conv_p:
            y = jnp.dot(W_ref[...], x, preferred_element_type=jnp.float32)
            y = jnp.maximum(y + h_ref[...], 0.0)
            x = y.astype(jnp.bfloat16)
        # x: embedding, (C_o, S_b) bf16, lane-dense, columns k-major.

        # ---- attention: max over channels, softmax over the K neighbour slabs ----
        x1 = jnp.max(x, axis=0, keepdims=True).astype(jnp.float32)  # (1, S_b)

        def slab(v, kk):                     # aligned 128-multiple lane slice, no relayout
            return v[:, kk * M_b:(kk + 1) * M_b]

        m = slab(x1, 0)
        for kk in range(1, K):
            m = jnp.maximum(m, slab(x1, kk))                        # (1, M_b)
        e = [jnp.exp(slab(x1, kk) - m) for kk in range(K)]
        denom = e[0]
        for kk in range(1, K):
            denom = denom + e[kk]
        inv = pl.reciprocal(denom, approx=True)                     # (1, M_b), EUP slot

        # ---- K-weighted reductions: keypoints, attentive feature (map) ----
        kx = kx_ref[...]                                            # (3, S_b) f32
        kp = None                                                   # (3, M_b)
        af = None                                                   # (C_o, M_b)
        for kk in range(K):
            w_k = e[kk] * inv                                       # (1, M_b)
            kp_k = slab(kx, kk) * w_k
            a_k = slab(x, kk).astype(jnp.float32) * w_k             # (C_o, M_b) f32
            afm_ref[:, kk * M_b:(kk + 1) * M_b] = a_k.astype(afm_ref.dtype)
            kp = kp_k if kp is None else kp + kp_k
            af = a_k if af is None else af + a_k
        af_ref[...] = af

        # ---- sigma head: [Conv1d + folded BN + ReLU] x2, Conv1d->1, softplus + 1e-3 ----
        y = af
        for (W_ref, h_ref) in mlp_p:
            y = jnp.maximum(
                jnp.dot(W_ref[...], y, preferred_element_type=jnp.float32) + h_ref[...],
                0.0)
        sg = jnp.dot(Wm3_ref[...], y, preferred_element_type=jnp.float32) + bm3_ref[...]
        sig = jax.nn.softplus(sg) + 0.001                           # (1, M_b)

        # keypoints (3 rows) + sigma (1 row) packed into one small output block.
        ks_ref[...] = jnp.concatenate([kp, sig], axis=0)            # (4, M_b)

    return kernel


# --------------------------- block-size selection ----------------------------
def _vmem_capacity_bytes():
    try:
        cap = int(getattr(pltpu.get_tpu_info(), "vmem_capacity_bytes", 0))
        if cap > 0:
            return cap
    except Exception:
        pass
    return 64 * 1024 * 1024        # conservative: v7x per-TensorCore VMEM


def pick_batch_block(B, M, K, C_g, C_o, budget_bytes):
    """VMEM-byte-aware choice of how many batch elements to fold into lanes.

    Hard constraint (compile safety): blocked lane widths must be 128-multiples,
    or the block must span the full array (bb == B).  Soft preferences, in
    order: fits the VMEM budget, >1 grid step (don't idle a v7x TensorCore),
    >=4 grid steps (>=2 pipelined steps per core), even step count, largest bb.
    """
    def pad8(r):
        return -(-r // 8) * 8

    def block_bytes(bb):
        S_b, M_b = bb * M * K, bb * M
        b = 0
        b += 2 * pad8(C_g) * S_b * 2                 # grouped in (bf16), double-buffered
        b += 2 * pad8(3) * S_b * 4                   # knn in (f32)
        b += 2 * pad8(C_o) * S_b * 2                 # afm out (bf16)
        b += 2 * pad8(C_o) * M_b * 4                 # af out (f32)
        b += 2 * pad8(4) * M_b * 4                   # keypoints+sigma out (f32)
        b += 4 * pad8(max(C_g, C_o)) * S_b * 4       # live activations / temporaries
        return b

    cands = [bb for bb in range(1, B + 1)
             if B % bb == 0 and ((bb * M) % 128 == 0 or bb == B)]

    def score(bb):
        nb = B // bb
        return (block_bytes(bb) <= budget_bytes,     # must fit scoped VMEM
                nb > 1,                              # never grid=(1,) if avoidable
                nb >= 4,                             # v7x: >=2 steps per TensorCore
                nb % 2 == 0,                         # even split across 2 TCs
                bb)                                  # then largest (amortize step cost)

    return max(cands, key=score)


# ------------------------------ kernel driver --------------------------------
def run_detector(grouped, knn_xyz, params):
    """grouped: [B, M, K, C_g] f32, knn_xyz: [B, M, K, 3] f32 -> fused detector head."""
    B, M, K, C_g = grouped.shape
    conv, mlp = params["conv"], params["mlp"]
    Wm3, bm3 = params["mlp3"]
    C_o = conv[-1][0].shape[0]

    vmem_cap = _vmem_capacity_bytes()
    b_blk = pick_batch_block(B, M, K, C_g, C_o, budget_bytes=vmem_cap // 2)
    nb = B // b_blk
    M_b = b_blk * M
    S_b = M_b * K

    # k-major, batch-block-major flattening (one-time XLA layout plumbing):
    #   global column = block*S_b + kk*M_b + local_b*M + m
    def to_flat(a):                      # [B, M, K, C] -> (C, nb*K*b_blk*M)
        C = a.shape[-1]
        a = a.reshape(nb, b_blk, M, K, C)
        a = jnp.transpose(a, (4, 0, 3, 1, 2))
        return a.reshape(C, nb * K * b_blk * M)

    grouped_flat = to_flat(grouped).astype(jnp.bfloat16)   # big input: bf16 halves HBM read
    knn_flat = to_flat(knn_xyz)                            # (3, cols) f32 (keypoint precision)

    def col_spec(rows, cols):                              # blocked along lanes only
        return pl.BlockSpec((rows, cols), lambda b: (0, b))

    def param_spec(arr):                                   # resident across grid steps
        return pl.BlockSpec(arr.shape, lambda b: (0, 0))

    args = [grouped_flat, knn_flat]
    in_specs = [col_spec(C_g, S_b), col_spec(3, S_b)]
    for group in (*conv, *mlp):
        for a in group:
            args.append(a)
            in_specs.append(param_spec(a))
    for a in (Wm3, bm3):
        args.append(a)
        in_specs.append(param_spec(a))

    out_shape = (
        jax.ShapeDtypeStruct((4, B * M), jnp.float32),          # keypoints(3) + sigma(1)
        jax.ShapeDtypeStruct((C_o, B * M), jnp.float32),        # attentive_feature
        jax.ShapeDtypeStruct((C_o, B * M * K), jnp.bfloat16),   # attentive_feature_map (bf16)
    )
    out_specs = (col_spec(4, M_b), col_spec(C_o, M_b), col_spec(C_o, S_b))

    ks, af, afm = pl.pallas_call(
        make_detector_kernel(len(conv), K, M_b),
        grid=(nb,),
        in_specs=in_specs,
        out_specs=out_specs,
        out_shape=out_shape,
        compiler_params=pltpu.CompilerParams(
            dimension_semantics=("parallel",),                  # batch blocks independent
            vmem_limit_bytes=int(min(vmem_cap * 3 // 4, 100 * 1024 * 1024)),
        ),
    )(*args)

    # un-flatten back to the PyTorch layouts (cheap XLA reshape/transpose outside).
    keypoints = jnp.transpose(ks[:3].reshape(3, B, M), (1, 2, 0))            # [B,M,3]
    sigmas = ks[3].reshape(B, M)                                             # [B,M]
    attentive_feature = jnp.transpose(af.reshape(C_o, B, M), (1, 0, 2))      # [B,C_o,M]
    afm = afm.reshape(C_o, nb, K, b_blk, M)
    attentive_feature_map = jnp.transpose(afm, (1, 3, 0, 4, 2)).reshape(B, C_o, M, K)
    return keypoints, sigmas, attentive_feature, attentive_feature_map


# ------------------------------ JAX glue -------------------------------------
def furthest_point_sample(xyz, nsample):
    """Deterministic FPS (seed index 0), [B,N,3] -> [B,nsample] int32."""
    B, N, _ = xyz.shape

    def one(pts):
        def body(i, carry):
            idxs, dists, last = carry
            d = jnp.sum((pts - pts[last]) ** 2, axis=-1)
            dists = jnp.minimum(dists, d)
            nxt = jnp.argmax(dists).astype(jnp.int32)
            idxs = idxs.at[i].set(nxt)
            return idxs, dists, nxt

        idxs0 = jnp.zeros((nsample,), jnp.int32)
        dists0 = jnp.full((N,), jnp.inf, jnp.float32)
        idxs, _, _ = lax.fori_loop(1, nsample, body, (idxs0, dists0, jnp.int32(0)))
        return idxs

    return jax.vmap(one)(xyz)


def keypoint_detector_forward(xyz, features, params, nsample, k):
    """xyz: [B,N,3] f32, features: [B,N,C_in] f32."""
    B, N, _ = xyz.shape
    C_in = features.shape[-1]
    M = nsample

    # fps=True path (weights=None)
    fps_idx = furthest_point_sample(xyz, nsample)                        # [B,M]
    sampled_xyz = jnp.take_along_axis(xyz, fps_idx[..., None], axis=1)   # [B,M,3]

    # knn_group
    diff = sampled_xyz[:, :, None, :] - xyz[:, None, :, :]               # [B,M,N,3]
    d2 = jnp.sum(diff * diff, axis=-1)                                   # [B,M,N]
    _, knn_idx = lax.top_k(-d2, k)                                       # [B,M,k]
    knn_xyz = jax.vmap(lambda p, i: p[i])(xyz, knn_idx)                  # [B,M,k,3]
    knn_feat = jax.vmap(lambda f, i: f[i])(features, knn_idx)            # [B,M,k,C_in]

    rela_xyz = knn_xyz - sampled_xyz[:, :, None, :]
    rela_dist = jnp.sqrt(jnp.sum(rela_xyz * rela_xyz, axis=-1, keepdims=True))
    grouped = jnp.concatenate([rela_xyz, rela_dist, knn_feat], axis=-1)  # [B,M,k,4+C]
    grouped_features = jnp.transpose(grouped, (0, 3, 1, 2))              # [B,4+C,M,k]

    keypoints, sigmas, attentive_feature, attentive_feature_map = run_detector(
        grouped, knn_xyz, params)
    return keypoints, sigmas, attentive_feature, grouped_features, attentive_feature_map


def init_params(key, C_in, out_channels, eps=1e-5):
    """Random PyTorch-equivalent params with BatchNorm (inference) folded into the
    weights: W' = s*W, shift = beta - s*mean (+ s*b for the biased Conv1d layers),
    where s = gamma / sqrt(var + eps).  Conv-stack weights are stored as bf16."""
    chans = [C_in + 4] + list(out_channels)
    keys = iter(jax.random.split(key, 8 * (len(chans) + 4)))

    def bn(c):
        gamma = 1.0 + 0.1 * jax.random.normal(next(keys), (c,), jnp.float32)
        beta = 0.1 * jax.random.normal(next(keys), (c,), jnp.float32)
        mean = 0.05 * jax.random.normal(next(keys), (c,), jnp.float32)
        var = 1.0 + 0.1 * jnp.abs(jax.random.normal(next(keys), (c,), jnp.float32))
        s = gamma / jnp.sqrt(var + eps)
        h = beta - mean * s
        return s.reshape(c, 1), h.reshape(c, 1)

    conv = []
    for i in range(1, len(chans)):
        W = 0.2 * jax.random.normal(next(keys), (chans[i], chans[i - 1]), jnp.float32)
        s, h = bn(chans[i])
        conv.append(((s * W).astype(jnp.bfloat16), h))        # BN scale folded; bf16 MXU

    C_o = chans[-1]
    mlp = []
    for _ in range(2):
        W = 0.2 * jax.random.normal(next(keys), (C_o, C_o), jnp.float32)
        b = 0.1 * jax.random.normal(next(keys), (C_o, 1), jnp.float32)
        s, h = bn(C_o)
        mlp.append((s * W, s * b + h))                        # sigma head stays f32

    Wm3 = 0.2 * jax.random.normal(next(keys), (1, C_o), jnp.float32)
    bm3 = 0.1 * jax.random.normal(next(keys), (1, 1), jnp.float32)
    return {"conv": conv, "mlp": mlp, "mlp3": (Wm3, bm3)}


if __name__ == "__main__":
    # M=32 keeps bb*M a 128-multiple at bb=4, so the VMEM-aware picker lands on
    # grid=(4,) (>=2 steps per v7x TensorCore), M_b=128, S_b=1024 lanes per step.
    B, N, C_in = 16, 128, 4
    nsample, k = 32, 8
    out_channels = (32, 64)

    key = jax.random.PRNGKey(0)
    k_xyz, k_feat, k_par = jax.random.split(key, 3)
    xyz = jax.random.normal(k_xyz, (B, N, 3), jnp.float32)
    features = jax.random.normal(k_feat, (B, N, C_in), jnp.float32)
    params = init_params(k_par, C_in, out_channels)

    outs = keypoint_detector_forward(xyz, features, params, nsample, k)
    outs = jax.block_until_ready(outs)
    keypoints, sigmas, af, grouped_features, afm = outs

    assert keypoints.shape == (B, nsample, 3)
    assert sigmas.shape == (B, nsample)
    assert af.shape == (B, out_channels[-1], nsample)
    assert grouped_features.shape == (B, C_in + 4, nsample, k)
    assert afm.shape == (B, out_channels[-1], nsample, k)
    assert bool(jnp.all(jnp.isfinite(keypoints)))
    assert bool(jnp.all(jnp.isfinite(af)))
    assert bool(jnp.all(jnp.isfinite(afm.astype(jnp.float32))))
    assert bool(jnp.all(sigmas > 0.001 - 1e-6))
    print("KERNEL_OK")
</pallas_src>

<mosaic_0001>
module attributes {stable_mosaic.version = 11 : i64} {
  func.func @kernel(%arg0: i32, %arg1: memref<8x1024xbf16, #tpu.memory_space<vmem>>, %arg2: memref<3x1024xf32, #tpu.memory_space<vmem>>, %arg3: memref<32x8xbf16, #tpu.memory_space<vmem>>, %arg4: memref<32x1xf32, #tpu.memory_space<vmem>>, %arg5: memref<64x32xbf16, #tpu.memory_space<vmem>>, %arg6: memref<64x1xf32, #tpu.memory_space<vmem>>, %arg7: memref<64x64xf32, #tpu.memory_space<vmem>>, %arg8: memref<64x1xf32, #tpu.memory_space<vmem>>, %arg9: memref<64x64xf32, #tpu.memory_space<vmem>>, %arg10: memref<64x1xf32, #tpu.memory_space<vmem>>, %arg11: memref<1x64xf32, #tpu.memory_space<vmem>>, %arg12: memref<1x1xf32, #tpu.memory_space<vmem>>, %arg13: memref<4x128xf32, #tpu.memory_space<vmem>>, %arg14: memref<64x128xf32, #tpu.memory_space<vmem>>, %arg15: memref<64x1024xbf16, #tpu.memory_space<vmem>>) attributes {dimension_semantics = [#tpu.dimension_semantics<parallel>], iteration_bounds = array<i64: 4>, scalar_prefetch = 0 : i64, scratch_operands = 0 : i64, tpu.core_type = #tpu.core_type<tc>, window_params = [{transform_indices = @transform_0, window_bounds = array<i64: 8, 1024>}, {transform_indices = @transform_1, window_bounds = array<i64: 3, 1024>}, {pipeline_mode = #tpu.pipeline_mode<synchronous>, transform_indices = @transform_2, window_bounds = array<i64: 32, 8>}, {pipeline_mode = #tpu.pipeline_mode<synchronous>, transform_indices = @transform_3, window_bounds = array<i64: 32, 1>}, {pipeline_mode = #tpu.pipeline_mode<synchronous>, transform_indices = @transform_4, window_bounds = array<i64: 64, 32>}, {pipeline_mode = #tpu.pipeline_mode<synchronous>, transform_indices = @transform_5, window_bounds = array<i64: 64, 1>}, {pipeline_mode = #tpu.pipeline_mode<synchronous>, transform_indices = @transform_6, window_bounds = array<i64: 64, 64>}, {pipeline_mode = #tpu.pipeline_mode<synchronous>, transform_indices = @transform_7, window_bounds = array<i64: 64, 1>}, {pipeline_mode = #tpu.pipeline_mode<synchronous>, transform_indices = @transform_8, window_bounds = array<i64: 64, 64>}, {pipeline_mode = #tpu.pipeline_mode<synchronous>, transform_indices = @transform_9, window_bounds = array<i64: 64, 1>}, {pipeline_mode = #tpu.pipeline_mode<synchronous>, transform_indices = @transform_10, window_bounds = array<i64: 1, 64>}, {pipeline_mode = #tpu.pipeline_mode<synchronous>, transform_indices = @transform_11, window_bounds = array<i64: 1, 1>}, {transform_indices = @transform_12, window_bounds = array<i64: 4, 128>}, {transform_indices = @transform_13, window_bounds = array<i64: 64, 128>}, {transform_indices = @transform_14, window_bounds = array<i64: 64, 1024>}]} {
    %c0 = arith.constant 0 : index
    %c0_0 = arith.constant 0 : index
    %0 = vector.load %arg1[%c0, %c0_0] : memref<8x1024xbf16, #tpu.memory_space<vmem>>, vector<8x1024xbf16>
    %c0_1 = arith.constant 0 : index
    %c0_2 = arith.constant 0 : index
    %1 = vector.load %arg3[%c0_1, %c0_2] : memref<32x8xbf16, #tpu.memory_space<vmem>>, vector<32x8xbf16>
    %cst = arith.constant dense<0.000000e+00> : vector<32x1024xf32>
    %2 = tpu.matmul %1, %0, %cst {dimension_numbers = #tpu.dot_dimension_numbers<[1], [0], [0], [1], [0, 0, 1, 1], [], []>} : vector<32x8xbf16>, vector<8x1024xbf16>, vector<32x1024xf32> -> vector<32x1024xf32>
    %c0_3 = arith.constant 0 : index
    %c0_4 = arith.constant 0 : index
    %3 = vector.load %arg4[%c0_3, %c0_4] : memref<32x1xf32, #tpu.memory_space<vmem>>, vector<32x1xf32>
    %4 = vector.broadcast %3 : vector<32x1xf32> to vector<32x1024xf32>
    %5 = arith.addf %2, %4 : vector<32x1024xf32>
    %cst_5 = arith.constant 0.000000e+00 : f32
    %6 = vector.broadcast %cst_5 : f32 to vector<32x1024xf32>
    %7 = arith.maximumf %5, %6 : vector<32x1024xf32>
    %8 = arith.truncf %7 : vector<32x1024xf32> to vector<32x1024xbf16>
    %c0_6 = arith.constant 0 : index
    %c0_7 = arith.constant 0 : index
    %9 = vector.load %arg5[%c0_6, %c0_7] : memref<64x32xbf16, #tpu.memory_space<vmem>>, vector<64x32xbf16>
    %cst_8 = arith.constant dense<0.000000e+00> : vector<64x1024xf32>
    %10 = tpu.matmul %9, %8, %cst_8 {dimension_numbers = #tpu.dot_dimension_numbers<[1], [0], [0], [1], [0, 0, 1, 1], [], []>} : vector<64x32xbf16>, vector<32x1024xbf16>, vector<64x1024xf32> -> vector<64x1024xf32>
    %c0_9 = arith.constant 0 : index
    %c0_10 = arith.constant 0 : index
    %11 = vector.load %arg6[%c0_9, %c0_10] : memref<64x1xf32, #tpu.memory_space<vmem>>, vector<64x1xf32>
    %12 = vector.broadcast %11 : vector<64x1xf32> to vector<64x1024xf32>
    %13 = arith.addf %10, %12 : vector<64x1024xf32>
    %cst_11 = arith.constant 0.000000e+00 : f32
    %14 = vector.broadcast %cst_11 : f32 to vector<64x1024xf32>
    %15 = arith.maximumf %13, %14 : vector<64x1024xf32>
    %16 = arith.truncf %15 : vector<64x1024xf32> to vector<64x1024xbf16>
    %cst_12 = arith.constant dense<0xFF80> : vector<1024xbf16>
    %17 = vector.multi_reduction <maximumf>, %16, %cst_12 [0] : vector<64x1024xbf16> to vector<1024xbf16>
    %18 = vector.shape_cast %17 : vector<1024xbf16> to vector<1x1024xbf16>
    %19 = arith.extf %18 : vector<1x1024xbf16> to vector<1x1024xf32>
    %20 = vector.extract_strided_slice %19 {offsets = [0, 0], sizes = [1, 128], strides = [1, 1]} : vector<1x1024xf32> to vector<1x128xf32>
    %21 = vector.extract_strided_slice %19 {offsets = [0, 128], sizes = [1, 128], strides = [1, 1]} : vector<1x1024xf32> to vector<1x128xf32>
    %22 = arith.maximumf %20, %21 : vector<1x128xf32>
    %23 = vector.extract_strided_slice %19 {offsets = [0, 256], sizes = [1, 128], strides = [1, 1]} : vector<1x1024xf32> to vector<1x128xf32>
    %24 = arith.maximumf %22, %23 : vector<1x128xf32>
    %25 = vector.extract_strided_slice %19 {offsets = [0, 384], sizes = [1, 128], strides = [1, 1]} : vector<1x1024xf32> to vector<1x128xf32>
    %26 = arith.maximumf %24, %25 : vector<1x128xf32>
    %27 = vector.extract_strided_slice %19 {offsets = [0, 512], sizes = [1, 128], strides = [1, 1]} : vector<1x1024xf32> to vector<1x128xf32>
    %28 = arith.maximumf %26, %27 : vector<1x128xf32>
    %29 = vector.extract_strided_slice %19 {offsets = [0, 640], sizes = [1, 128], strides = [1, 1]} : vector<1x1024xf32> to vector<1x128xf32>
    %30 = arith.maximumf %28, %29 : vector<1x128xf32>
    %31 = vector.extract_strided_slice %19 {offsets = [0, 768], sizes = [1, 128], strides = [1, 1]} : vector<1x1024xf32> to vector<1x128xf32>
    %32 = arith.maximumf %30, %31 : vector<1x128xf32>
    %33 = vector.extract_strided_slice %19 {offsets = [0, 896], sizes = [1, 128], strides = [1, 1]} : vector<1x1024xf32> to vector<1x128xf32>
    %34 = arith.maximumf %32, %33 : vector<1x128xf32>
    %35 = vector.extract_strided_slice %19 {offsets = [0, 0], sizes = [1, 128], strides = [1, 1]} : vector<1x1024xf32> to vector<1x128xf32>
    %36 = arith.subf %35, %34 : vector<1x128xf32>
    %37 = math.exp %36 : vector<1x128xf32>
    %38 = vector.extract_strided_slice %19 {offsets = [0, 128], sizes = [1, 128], strides = [1, 1]} : vector<1x1024xf32> to vector<1x128xf32>
    %39 = arith.subf %38, %34 : vector<1x128xf32>
    %40 = math.exp %39 : vector<1x128xf32>
    %41 = vector.extract_strided_slice %19 {offsets = [0, 256], sizes = [1, 128], strides = [1, 1]} : vector<1x1024xf32> to vector<1x128xf32>
    %42 = arith.subf %41, %34 : vector<1x128xf32>
    %43 = math.exp %42 : vector<1x128xf32>
    %44 = vector.extract_strided_slice %19 {offsets = [0, 384], sizes = [1, 128], strides = [1, 1]} : vector<1x1024xf32> to vector<1x128xf32>
    %45 = arith.subf %44, %34 : vector<1x128xf32>
    %46 = math.exp %45 : vector<1x128xf32>
    %47 = vector.extract_strided_slice %19 {offsets = [0, 512], sizes = [1, 128], strides = [1, 1]} : vector<1x1024xf32> to vector<1x128xf32>
    %48 = arith.subf %47, %34 : vector<1x128xf32>
    %49 = math.exp %48 : vector<1x128xf32>
    %50 = vector.extract_strided_slice %19 {offsets = [0, 640], sizes = [1, 128], strides = [1, 1]} : vector<1x1024xf32> to vector<1x128xf32>
    %51 = arith.subf %50, %34 : vector<1x128xf32>
    %52 = math.exp %51 : vector<1x128xf32>
    %53 = vector.extract_strided_slice %19 {offsets = [0, 768], sizes = [1, 128], strides = [1, 1]} : vector<1x1024xf32> to vector<1x128xf32>
    %54 = arith.subf %53, %34 : vector<1x128xf32>
    %55 = math.exp %54 : vector<1x128xf32>
    %56 = vector.extract_strided_slice %19 {offsets = [0, 896], sizes = [1, 128], strides = [1, 1]} : vector<1x1024xf32> to vector<1x128xf32>
    %57 = arith.subf %56, %34 : vector<1x128xf32>
    %58 = math.exp %57 : vector<1x128xf32>
    %59 = arith.addf %37, %40 : vector<1x128xf32>
    %60 = arith.addf %59, %43 : vector<1x128xf32>
    %61 = arith.addf %60, %46 : vector<1x128xf32>
    %62 = arith.addf %61, %49 : vector<1x128xf32>
    %63 = arith.addf %62, %52 : vector<1x128xf32>
    %64 = arith.addf %63, %55 : vector<1x128xf32>
    %65 = arith.addf %64, %58 : vector<1x128xf32>
    %66 = tpu.reciprocal %65 {approx = true} : vector<1x128xf32> -> vector<1x128xf32>
    %c0_13 = arith.constant 0 : index
    %c0_14 = arith.constant 0 : index
    %67 = vector.load %arg2[%c0_13, %c0_14] : memref<3x1024xf32, #tpu.memory_space<vmem>>, vector<3x1024xf32>
    %68 = arith.mulf %37, %66 : vector<1x128xf32>
    %69 = vector.extract_strided_slice %67 {offsets = [0, 0], sizes = [3, 128], strides = [1, 1]} : vector<3x1024xf32> to vector<3x128xf32>
    %70 = vector.broadcast %68 : vector<1x128xf32> to vector<3x128xf32>
    %71 = arith.mulf %69, %70 : vector<3x128xf32>
    %72 = vector.extract_strided_slice %16 {offsets = [0, 0], sizes = [64, 128], strides = [1, 1]} : vector<64x1024xbf16> to vector<64x128xbf16>
    %73 = arith.extf %72 : vector<64x128xbf16> to vector<64x128xf32>
    %74 = vector.broadcast %68 : vector<1x128xf32> to vector<64x128xf32>
    %75 = arith.mulf %73, %74 : vector<64x128xf32>
    %76 = arith.truncf %75 : vector<64x128xf32> to vector<64x128xbf16>
    %c0_15 = arith.constant 0 : index
    %c0_16 = arith.constant 0 : index
    %77 = vector.load %arg15[%c0_15, %c0_16] : memref<64x1024xbf16, #tpu.memory_space<vmem>>, vector<64x128xbf16>
    tpu.vector_store %arg15[%c0_15, %c0_16], %76 {strides = array<i32>} : memref<64x1024xbf16, #tpu.memory_space<vmem>>, vector<64x128xbf16>,
    %78 = arith.mulf %40, %66 : vector<1x128xf32>
    %79 = vector.extract_strided_slice %67 {offsets = [0, 128], sizes = [3, 128], strides = [1, 1]} : vector<3x1024xf32> to vector<3x128xf32>
    %80 = vector.broadcast %78 : vector<1x128xf32> to vector<3x128xf32>
    %81 = arith.mulf %79, %80 : vector<3x128xf32>
    %82 = vector.extract_strided_slice %16 {offsets = [0, 128], sizes = [64, 128], strides = [1, 1]} : vector<64x1024xbf16> to vector<64x128xbf16>
    %83 = arith.extf %82 : vector<64x128xbf16> to vector<64x128xf32>
    %84 = vector.broadcast %78 : vector<1x128xf32> to vector<64x128xf32>
    %85 = arith.mulf %83, %84 : vector<64x128xf32>
    %86 = arith.truncf %85 : vector<64x128xf32> to vector<64x128xbf16>
    %c0_17 = arith.constant 0 : index
    %c128 = arith.constant 128 : index
    %87 = vector.load %arg15[%c0_17, %c128] : memref<64x1024xbf16, #tpu.memory_space<vmem>>, vector<64x128xbf16>
    tpu.vector_store %arg15[%c0_17, %c128], %86 {strides = array<i32>} : memref<64x1024xbf16, #tpu.memory_space<vmem>>, vector<64x128xbf16>,
    %88 = arith.addf %71, %81 : vector<3x128xf32>
    %89 = arith.addf %75, %85 : vector<64x128xf32>
    %90 = arith.mulf %43, %66 : vector<1x128xf32>
    %91 = vector.extract_strided_slice %67 {offsets = [0, 256], sizes = [3, 128], strides = [1, 1]} : vector<3x1024xf32> to vector<3x128xf32>
    %92 = vector.broadcast %90 : vector<1x128xf32> to vector<3x128xf32>
    %93 = arith.mulf %91, %92 : vector<3x128xf32>
    %94 = vector.extract_strided_slice %16 {offsets = [0, 256], sizes = [64, 128], strides = [1, 1]} : vector<64x1024xbf16> to vector<64x128xbf16>
    %95 = arith.extf %94 : vector<64x128xbf16> to vector<64x128xf32>
    %96 = vector.broadcast %90 : vector<1x128xf32> to vector<64x128xf32>
    %97 = arith.mulf %95, %96 : vector<64x128xf32>
    %98 = arith.truncf %97 : vector<64x128xf32> to vector<64x128xbf16>
    %c0_18 = arith.constant 0 : index
    %c256 = arith.constant 256 : index
    %99 = vector.load %arg15[%c0_18, %c256] : memref<64x1024xbf16, #tpu.memory_space<vmem>>, vector<64x128xbf16>
    tpu.vector_store %arg15[%c0_18, %c256], %98 {strides = array<i32>} : memref<64x1024xbf16, #tpu.memory_space<vmem>>, vector<64x128xbf16>,
    %100 = arith.addf %88, %93 : vector<3x128xf32>
    %101 = arith.addf %89, %97 : vector<64x128xf32>
    %102 = arith.mulf %46, %66 : vector<1x128xf32>
    %103 = vector.extract_strided_slice %67 {offsets = [0, 384], sizes = [3, 128], strides = [1, 1]} : vector<3x1024xf32> to vector<3x128xf32>
    %104 = vector.broadcast %102 : vector<1x128xf32> to vector<3x128xf32>
    %105 = arith.mulf %103, %104 : vector<3x128xf32>
    %106 = vector.extract_strided_slice %16 {offsets = [0, 384], sizes = [64, 128], strides = [1, 1]} : vector<64x1024xbf16> to vector<64x128xbf16>
    %107 = arith.extf %106 : vector<64x128xbf16> to vector<64x128xf32>
    %108 = vector.broadcast %102 : vector<1x128xf32> to vector<64x128xf32>
    %109 = arith.mulf %107, %108 : vector<64x128xf32>
    %110 = arith.truncf %109 : vector<64x128xf32> to vector<64x128xbf16>
    %c0_19 = arith.constant 0 : index
    %c384 = arith.constant 384 : index
    %111 = vector.load %arg15[%c0_19, %c384] : memref<64x1024xbf16, #tpu.memory_space<vmem>>, vector<64x128xbf16>
    tpu.vector_store %arg15[%c0_19, %c384], %110 {strides = array<i32>} : memref<64x1024xbf16, #tpu.memory_space<vmem>>, vector<64x128xbf16>,
    %112 = arith.addf %100, %105 : vector<3x128xf32>
    %113 = arith.addf %101, %109 : vector<64x128xf32>
    %114 = arith.mulf %49, %66 : vector<1x128xf32>
    %115 = vector.extract_strided_slice %67 {offsets = [0, 512], sizes = [3, 128], strides = [1, 1]} : vector<3x1024xf32> to vector<3x128xf32>
    %116 = vector.broadcast %114 : vector<1x128xf32> to vector<3x128xf32>
    %117 = arith.mulf %115, %116 : vector<3x128xf32>
    %118 = vector.extract_strided_slice %16 {offsets = [0, 512], sizes = [64, 128], strides = [1, 1]} : vector<64x1024xbf16> to vector<64x128xbf16>
    %119 = arith.extf %118 : vector<64x128xbf16> to vector<64x128xf32>
    %120 = vector.broadcast %114 : vector<1x128xf32> to vector<64x128xf32>
    %121 = arith.mulf %119, %120 : vector<64x128xf32>
    %122 = arith.truncf %121 : vector<64x128xf32> to vector<64x128xbf16>
    %c0_20 = arith.constant 0 : index
    %c512 = arith.constant 512 : index
    %123 = vector.load %arg15[%c0_20, %c512] : memref<64x1024xbf16, #tpu.memory_space<vmem>>, vector<64x128xbf16>
    tpu.vector_store %arg15[%c0_20, %c512], %122 {strides = array<i32>} : memref<64x1024xbf16, #tpu.memory_space<vmem>>, vector<64x128xbf16>,
    %124 = arith.addf %112, %117 : vector<3x128xf32>
    %125 = arith.addf %113, %121 : vector<64x128xf32>
    %126 = arith.mulf %52, %66 : vector<1x128xf32>
    %127 = vector.extract_strided_slice %67 {offsets = [0, 640], sizes = [3, 128], strides = [1, 1]} : vector<3x1024xf32> to vector<3x128xf32>
    %128 = vector.broadcast %126 : vector<1x128xf32> to vector<3x128xf32>
    %129 = arith.mulf %127, %128 : vector<3x128xf32>
    %130 = vector.extract_strided_slice %16 {offsets = [0, 640], sizes = [64, 128], strides = [1, 1]} : vector<64x1024xbf16> to vector<64x128xbf16>
    %131 = arith.extf %130 : vector<64x128xbf16> to vector<64x128xf32>
    %132 = vector.broadcast %126 : vector<1x128xf32> to vector<64x128xf32>
    %133 = arith.mulf %131, %132 : vector<64x128xf32>
    %134 = arith.truncf %133 : vector<64x128xf32> to vector<64x128xbf16>
    %c0_21 = arith.constant 0 : index
    %c640 = arith.constant 640 : index
    %135 = vector.load %arg15[%c0_21, %c640] : memref<64x1024xbf16, #tpu.memory_space<vmem>>, vector<64x128xbf16>
    tpu.vector_store %arg15[%c0_21, %c640], %134 {strides = array<i32>} : memref<64x1024xbf16, #tpu.memory_space<vmem>>, vector<64x128xbf16>,
    %136 = arith.addf %124, %129 : vector<3x128xf32>
    %137 = arith.addf %125, %133 : vector<64x128xf32>
    %138 = arith.mulf %55, %66 : vector<1x128xf32>
    %139 = vector.extract_strided_slice %67 {offsets = [0, 768], sizes = [3, 128], strides = [1, 1]} : vector<3x1024xf32> to vector<3x128xf32>
    %140 = vector.broadcast %138 : vector<1x128xf32> to vector<3x128xf32>
    %141 = arith.mulf %139, %140 : vector<3x128xf32>
    %142 = vector.extract_strided_slice %16 {offsets = [0, 768], sizes = [64, 128], strides = [1, 1]} : vector<64x1024xbf16> to vector<64x128xbf16>
    %143 = arith.extf %142 : vector<64x128xbf16> to vector<64x128xf32>
    %144 = vector.broadcast %138 : vector<1x128xf32> to vector<64x128xf32>
    %145 = arith.mulf %143, %144 : vector<64x128xf32>
    %146 = arith.truncf %145 : vector<64x128xf32> to vector<64x128xbf16>
    %c0_22 = arith.constant 0 : index
    %c768 = arith.constant 768 : index
    %147 = vector.load %arg15[%c0_22, %c768] : memref<64x1024xbf16, #tpu.memory_space<vmem>>, vector<64x128xbf16>
    tpu.vector_store %arg15[%c0_22, %c768], %146 {strides = array<i32>} : memref<64x1024xbf16, #tpu.memory_space<vmem>>, vector<64x128xbf16>,
    %148 = arith.addf %136, %141 : vector<3x128xf32>
    %149 = arith.addf %137, %145 : vector<64x128xf32>
    %150 = arith.mulf %58, %66 : vector<1x128xf32>
    %151 = vector.extract_strided_slice %67 {offsets = [0, 896], sizes = [3, 128], strides = [1, 1]} : vector<3x1024xf32> to vector<3x128xf32>
    %152 = vector.broadcast %150 : vector<1x128xf32> to vector<3x128xf32>
    %153 = arith.mulf %151, %152 : vector<3x128xf32>
    %154 = vector.extract_strided_slice %16 {offsets = [0, 896], sizes = [64, 128], strides = [1, 1]} : vector<64x1024xbf16> to vector<64x128xbf16>
    %155 = arith.extf %154 : vector<64x128xbf16> to vector<64x128xf32>
    %156 = vector.broadcast %150 : vector<1x128xf32> to vector<64x128xf32>
    %157 = arith.mulf %155, %156 : vector<64x128xf32>
    %158 = arith.truncf %157 : vector<64x128xf32> to vector<64x128xbf16>
    %c0_23 = arith.constant 0 : index
    %c896 = arith.constant 896 : index
    %159 = vector.load %arg15[%c0_23, %c896] : memref<64x1024xbf16, #tpu.memory_space<vmem>>, vector<64x128xbf16>
    tpu.vector_store %arg15[%c0_23, %c896], %158 {strides = array<i32>} : memref<64x1024xbf16, #tpu.memory_space<vmem>>, vector<64x128xbf16>,
    %160 = arith.addf %148, %153 : vector<3x128xf32>
    %161 = arith.addf %149, %157 : vector<64x128xf32>
    %c0_24 = arith.constant 0 : index
    %c0_25 = arith.constant 0 : index
    %162 = vector.load %arg14[%c0_24, %c0_25] : memref<64x128xf32, #tpu.memory_space<vmem>>, vector<64x128xf32>
    tpu.vector_store %arg14[%c0_24, %c0_25], %161 {strides = array<i32>} : memref<64x128xf32, #tpu.memory_space<vmem>>, vector<64x128xf32>,
    %c0_26 = arith.constant 0 : index
    %c0_27 = arith.constant 0 : index
    %163 = vector.load %arg7[%c0_26, %c0_27] : memref<64x64xf32, #tpu.memory_space<vmem>>, vector<64x64xf32>
    %cst_28 = arith.constant dense<0.000000e+00> : vector<64x128xf32>
    %164 = tpu.matmul %163, %161, %cst_28 {dimension_numbers = #tpu.dot_dimension_numbers<[1], [0], [0], [1], [0, 0, 1, 1], [], []>} : vector<64x64xf32>, vector<64x128xf32>, vector<64x128xf32> -> vector<64x128xf32>
    %c0_29 = arith.constant 0 : index
    %c0_30 = arith.constant 0 : index
    %165 = vector.load %arg8[%c0_29, %c0_30] : memref<64x1xf32, #tpu.memory_space<vmem>>, vector<64x1xf32>
    %166 = vector.broadcast %165 : vector<64x1xf32> to vector<64x128xf32>
    %167 = arith.addf %164, %166 : vector<64x128xf32>
    %cst_31 = arith.constant 0.000000e+00 : f32
    %168 = vector.broadcast %cst_31 : f32 to vector<64x128xf32>
    %169 = arith.maximumf %167, %168 : vector<64x128xf32>
    %c0_32 = arith.constant 0 : index
    %c0_33 = arith.constant 0 : index
    %170 = vector.load %arg9[%c0_32, %c0_33] : memref<64x64xf32, #tpu.memory_space<vmem>>, vector<64x64xf32>
    %cst_34 = arith.constant dense<0.000000e+00> : vector<64x128xf32>
    %171 = tpu.matmul %170, %169, %cst_34 {dimension_numbers = #tpu.dot_dimension_numbers<[1], [0], [0], [1], [0, 0, 1, 1], [], []>} : vector<64x64xf32>, vector<64x128xf32>, vector<64x128xf32> -> vector<64x128xf32>
    %c0_35 = arith.constant 0 : index
    %c0_36 = arith.constant 0 : index
    %172 = vector.load %arg10[%c0_35, %c0_36] : memref<64x1xf32, #tpu.memory_space<vmem>>, vector<64x1xf32>
    %173 = vector.broadcast %172 : vector<64x1xf32> to vector<64x128xf32>
    %174 = arith.addf %171, %173 : vector<64x128xf32>
    %cst_37 = arith.constant 0.000000e+00 : f32
    %175 = vector.broadcast %cst_37 : f32 to vector<64x128xf32>
    %176 = arith.maximumf %174, %175 : vector<64x128xf32>
    %c0_38 = arith.constant 0 : index
    %c0_39 = arith.constant 0 : index
    %177 = vector.load %arg11[%c0_38, %c0_39] : memref<1x64xf32, #tpu.memory_space<vmem>>, vector<1x64xf32>
    %cst_40 = arith.constant dense<0.000000e+00> : vector<1x128xf32>
    %178 = tpu.matmul %177, %176, %cst_40 {dimension_numbers = #tpu.dot_dimension_numbers<[1], [0], [0], [1], [0, 0, 1, 1], [], []>} : vector<1x64xf32>, vector<64x128xf32>, vector<1x128xf32> -> vector<1x128xf32>
    %c0_41 = arith.constant 0 : index
    %c0_42 = arith.constant 0 : index
    %179 = vector.load %arg12[%c0_41, %c0_42] : memref<1x1xf32, #tpu.memory_space<vmem>>, vector<1x1xf32>
    %180 = vector.broadcast %179 : vector<1x1xf32> to vector<1x128xf32>
    %181 = arith.addf %178, %180 : vector<1x128xf32>
    %cst_43 = arith.constant 0.000000e+00 : f32
    %182 = vector.broadcast %cst_43 : f32 to vector<1x128xf32>
    %183 = arith.maximumf %181, %182 : vector<1x128xf32>
    %184 = vector.broadcast %cst_43 : f32 to vector<1x128xf32>
    %185 = arith.subf %181, %184 : vector<1x128xf32>
    %186 = arith.cmpf one, %185, %185 : vector<1x128xf32>
    %187 = vector.broadcast %cst_43 : f32 to vector<1x128xf32>
    %188 = arith.addf %181, %187 : vector<1x128xf32>
    %189 = math.absf %185 : vector<1x128xf32>
    %cst_44 = arith.constant 0.000000e+00 : f32
    %190 = vector.broadcast %cst_44 : f32 to vector<1x128xf32>
    %191 = arith.subf %190, %189 : vector<1x128xf32>
    %192 = math.exp %191 : vector<1x128xf32>
    %193 = math.log1p %192 : vector<1x128xf32>
    %194 = arith.addf %183, %193 : vector<1x128xf32>
    %195 = arith.select %186, %188, %194 : vector<1x128xi1>, vector<1x128xf32>
    %cst_45 = arith.constant 1.000000e-03 : f32
    %196 = vector.broadcast %cst_45 : f32 to vector<1x128xf32>
    %197 = arith.addf %195, %196 : vector<1x128xf32>
    %198 = tpu.concatenate %160, %197 in 0 : vector<3x128xf32>, vector<1x128xf32> -> vector<4x128xf32>
    %c0_46 = arith.constant 0 : index
    %c0_47 = arith.constant 0 : index
    %199 = vector.load %arg13[%c0_46, %c0_47] : memref<4x128xf32, #tpu.memory_space<vmem>>, vector<4x128xf32>
    tpu.vector_store %arg13[%c0_46, %c0_47], %198 {strides = array<i32>} : memref<4x128xf32, #tpu.memory_space<vmem>>, vector<4x128xf32>,
    return
  }
  func.func @transform_0(%arg0: i32) -> (i32, i32) {
    %c0_i32 = arith.constant 0 : i32
    %c0_i32_0 = arith.constant 0 : i32
    return %c0_i32, %arg0 : i32, i32
  }
  func.func @transform_1(%arg0: i32) -> (i32, i32) {
    %c0_i32 = arith.constant 0 : i32
    %c0_i32_0 = arith.constant 0 : i32
    return %c0_i32, %arg0 : i32, i32
  }
  func.func @transform_2(%arg0: i32) -> (i32, i32) {
    %c0_i32 = arith.constant 0 : i32
    %c0_i32_0 = arith.constant 0 : i32
    %c0_i32_1 = arith.constant 0 : i32
    return %c0_i32, %c0_i32_0 : i32, i32
  }
  func.func @transform_3(%arg0: i32) -> (i32, i32) {
    %c0_i32 = arith.constant 0 : i32
    %c0_i32_0 = arith.constant 0 : i32
    %c0_i32_1 = arith.constant 0 : i32
    return %c0_i32, %c0_i32_0 : i32, i32
  }
  func.func @transform_4(%arg0: i32) -> (i32, i32) {
    %c0_i32 = arith.constant 0 : i32
    %c0_i32_0 = arith.constant 0 : i32
    %c0_i32_1 = arith.constant 0 : i32
    return %c0_i32, %c0_i32_0 : i32, i32
  }
  func.func @transform_5(%arg0: i32) -> (i32, i32) {
    %c0_i32 = arith.constant 0 : i32
    %c0_i32_0 = arith.constant 0 : i32
    %c0_i32_1 = arith.constant 0 : i32
    return %c0_i32, %c0_i32_0 : i32, i32
  }
  func.func @transform_6(%arg0: i32) -> (i32, i32) {
    %c0_i32 = arith.constant 0 : i32
    %c0_i32_0 = arith.constant 0 : i32
    %c0_i32_1 = arith.constant 0 : i32
    return %c0_i32, %c0_i32_0 : i32, i32
  }
  func.func @transform_7(%arg0: i32) -> (i32, i32) {
    %c0_i32 = arith.constant 0 : i32
    %c0_i32_0 = arith.constant 0 : i32
    %c0_i32_1 = arith.constant 0 : i32
    return %c0_i32, %c0_i32_0 : i32, i32
  }
  func.func @transform_8(%arg0: i32) -> (i32, i32) {
    %c0_i32 = arith.constant 0 : i32
    %c0_i32_0 = arith.constant 0 : i32
    %c0_i32_1 = arith.constant 0 : i32
    return %c0_i32, %c0_i32_0 : i32, i32
  }
  func.func @transform_9(%arg0: i32) -> (i32, i32) {
    %c0_i32 = arith.constant 0 : i32
    %c0_i32_0 = arith.constant 0 : i32
    %c0_i32_1 = arith.constant 0 : i32
    return %c0_i32, %c0_i32_0 : i32, i32
  }
  func.func @transform_10(%arg0: i32) -> (i32, i32) {
    %c0_i32 = arith.constant 0 : i32
    %c0_i32_0 = arith.constant 0 : i32
    %c0_i32_1 = arith.constant 0 : i32
    return %c0_i32, %c0_i32_0 : i32, i32
  }
  func.func @transform_11(%arg0: i32) -> (i32, i32) {
    %c0_i32 = arith.constant 0 : i32
    %c0_i32_0 = arith.constant 0 : i32
    %c0_i32_1 = arith.constant 0 : i32
    return %c0_i32, %c0_i32_0 : i32, i32
  }
  func.func @transform_12(%arg0: i32) -> (i32, i32) {
    %c0_i32 = arith.constant 0 : i32
    %c0_i32_0 = arith.constant 0 : i32
    return %c0_i32, %arg0 : i32, i32
  }
  func.func @transform_13(%arg0: i32) -> (i32, i32) {
    %c0_i32 = arith.constant 0 : i32
    %c0_i32_0 = arith.constant 0 : i32
    return %c0_i32, %arg0 : i32, i32
  }
  func.func @transform_14(%arg0: i32) -> (i32, i32) {
    %c0_i32 = arith.constant 0 : i32
    %c0_i32_0 = arith.constant 0 : i32
    return %c0_i32, %arg0 : i32, i32
  }
}

</mosaic_0001>

<bundles_post_ra>
// kernel: tpu_custom_call.1
= control target key start
LH: loop header
LB: loop body
LE: loop exit
PB: predicated region body
PF: predicated region fallthrough
CT: control target
= control target key end

     0   :  { %s4236_s0 = inlined_call_operand.vmem [shape: bf16[8,4096], index: 0, kind: input, shape index: {}]   ;;  %s4237_s1 = inlined_call_operand.hbm [shape: f32[3,4096], index: 1, kind: input, shape index: {}]   ;;  %s4238_s2 = inlined_call_operand.vmem [shape: bf16[32,8], index: 2, kind: input, shape index: {}]   ;;  %s4239_s3 = inlined_call_operand.vmem [shape: f32[32,1], index: 3, kind: input, shape index: {}]   ;;  %s4240_s4 = inlined_call_operand.vmem [shape: bf16[64,32], index: 4, kind: input, shape index: {}]   ;;  %s4241_s5 = inlined_call_operand.vmem [shape: f32[64,1], index: 5, kind: input, shape index: {}]   ;;  %s4242_s6 = inlined_call_operand.vmem [shape: f32[64,64], index: 6, kind: input, shape index: {}]   ;;  %s4243_s7 = inlined_call_operand.vmem [shape: f32[64,1], index: 7, kind: input, shape index: {}]   ;;  %s4244_s8 = inlined_call_operand.vmem [shape: f32[64,64], index: 8, kind: input, shape index: {}]   ;;  %s4245_s9 = inlined_call_operand.vmem [shape: f32[64,1], index: 9, kind: input, shape index: {}]   ;;  %s4246_s10 = inlined_call_operand.vmem [shape: f32[1,64], index: 10, kind: input, shape index: {}]   ;;  %s4247_s11 = inlined_call_operand.<no memory space> [shape: f32[1,1], index: 11, kind: input, shape index: {}]   ;;  %s4248_s12 = inlined_call_operand.hbm [shape: f32[4,512], index: 12, kind: output, shape index: {0}]   ;;  %s4249_s13 = inlined_call_operand.hbm [shape: f32[64,512], index: 13, kind: output, shape index: {1}]   ;;  %s4250_s14 = inlined_call_operand.hbm [shape: bf16[64,4096], index: 14, kind: output, shape index: {2}]  }
   0x1   :  { %4305 = sst [smem:[#allocation28_spill]] %s4236_s0  ;;  %v20_v0 = vstv %s4247_s11 }
   0x2   :  { %4306 = sst [smem:[#allocation29_spill]] %s4237_s1  ;;  %21 = vst [vmem:[#allocation2] sm:$0x1] %v20_v0 }
   0x3   :  { %4307 = sst [smem:[#allocation30_spill]] %s4238_s2 }
   0x4   :  { %4308 = sst [smem:[#allocation31_spill]] %s4239_s3 }
   0x5   :  { %4309 = sst [smem:[#allocation32_spill]] %s4248_s12 }
   0x6   :  { %4310 = sst [smem:[#allocation33_spill]] %s4250_s14 }
   0x7   :  { %22 = vsyncpa [#allocation4], 0 }
   0x8   :  { %24 = vsyncpa [#allocation4 + $0x1], 0 }
   0x9   :  { %25 = vsyncpa [#allocation5], 0 }
   0xa   :  { %27 = vsyncpa [#allocation5 + $0x1], 0 }
   0xb   :  { %28 = vsyncpa [#allocation8], 0 }
   0xc   :  { %30 = vsyncpa [#allocation8 + $0x1], 0  ;;  %s2851_s15 = smov 0   ;;  %s2853_s16 = smov 0  }
   0xd   :  { %s2855_s17 = smov 0   ;;  %s2857_s18 = smov 0  }
   0xe LB: > { %4311 = sst [smem:[#allocation13_spill]] %s2753_s15  ;;  %s2872_s11 = sadd.s32 4294967295, %s2765_s18   ;;  %s2765_s18 = sphi %s2857_s18, %s4388_s18   ;;  %s2761_s17 = sphi %s2855_s17, %s4390_s17   ;;  %s2757_s16 = sphi %s2853_s16, %s4392_s16   ;;  %s2753_s15 = sphi %s2851_s15, %s4391_s15  }
   0xf   : > { %4312 = sst [smem:[#allocation14_spill]] %s2761_s17  ;;  %s4255_s19 = sadd.s32 4294967294, %s2765_s18  }
  0x10   : > { %s2876_s20 = sadd.s32 1, %s2765_s18   ;;  %s69_s21 = sadd.s32 1, %s2761_s17 }
  0x11   : > { %4313 = sst [smem:[#allocation15_spill]] %s2876_s20  ;;  %s66_s22 = ssub.s32 %s2765_s18, %s2876_s20 }
  0x12   : > { %p76_p0 = scmp.ne.s32.totalorder %s2761_s17, %s2757_s16  ;;  %p67_p1 = scmp.eq.s32.totalorder %s66_s22, 0 }
  0x13   : > { %p77_p2 = scmp.eq.s32.totalorder %s2765_s18, 0  ;;  %p82_p3 = scmp.ne.s32.totalorder %s2757_s16, %s2753_s15 }
  0x14   : > { %p83_p4 = scmp.eq.s32.totalorder %s2872_s11, 0  ;;  %p316_p7 = scmp.eq.s32.totalorder %s2872_s11, 3 }
  0x15   : > { %s2888_s23 = scalar_select %p67_p1, %s2761_s17, %s69_s21  }
  0x16   : > { %p2890_p5 = por %p77_p2, %p76_p0  ;;  %p2894_p6 = por %p83_p4, %p82_p3 }
  0x17   : > { %4314 = sst [smem:[#allocation16_spill]] %s2888_s23  ;;  %p322_p8 = scmp.eq.s32.totalorder %s4255_s19, 3 }
  0x18   : > { %p2544_p9 = scmp.lt.s32.totalorder %s2765_s18, 4  ;;  %p2902_p10 = por %p316_p7, %p76_p0 }
  0x19   : > { %p2906_p11 = por %p322_p8, %p82_p3  ;;  %s433_s28 = sand.u32 1, %s2761_s17  }
  0x1a   : > { %s2514_s29 = sshll.u32 %s2765_s18, 5  ;;  %s2406_s30 = sshll.u32 %s433_s28, 5 }
  0x1b   : > { %s4318_s27 = scalar_select %p2906_p11, 1, 0 }
  0x1c   : > { %s4320_s1 = sld [smem:[#allocation29_spill]]  ;;  %s437_s15 = scalar_lea.vmem [#allocation3], %s2406_s30 }
  0x1d   : > { %4319 = sst [smem:[#allocation17_spill]] %s4318_s27  ;;  %s446_s12 = sshll.u32 %s437_s15, 4  ;;  %s447_s12 = int_to_ptr.vmem [resolvable:$true] %s446_s12 }
  0x1e   : > { %p2917_p12 = pnand %p2544_p9, %p2890_p5  ;;  %p2409_p13 = scmp.ge.s32.totalorder %s2765_s18, 1 }
  0x1f   : > { %p451_p0 = scmp.lt.s32.totalorder %s2765_s18, 5  ;;  %s434_s17 = scalar_lea.sflag [#allocation4], %s433_s28 }
  0x20   : > { %p2613_p2 = pneg %p2917_p12 }
  0x22   : > { %s442_s23 = scalar_lea.hbm %s4320_s1, %s2514_s29  ;;  %s2616_s24 = scalar_lea.hbm %s4320_s1, 128 }
  0x23   : > { %s444_s20 = sshll.u32 %s442_s23, 4  ;;  %s445_s20 = int_to_ptr.hbm [resolvable:$true] %s444_s20 }
  0x24   : > { %s2609_s27 = sshra.s32 %s445_s20, 4  ;;  %s2610_s27 = int_to_ptr.hbm [resolvable:$true] %s2609_s27 }
  0x25   : > { %s2611_s14 = scalar_lea.hbm %s2610_s27, 32  ;;  %p2617_p5 = scmp.lt.s32.totalorder %s2610_s27, %s4320_s1 }
  0x26   : > { %p2612_p1 = scmp.ne.s32.totalorder %s2610_s27, %s2611_s14  ;;  %p2618_p7 = scmp.lt.s32.totalorder %s2616_s24, %s2611_s14 }
  0x28   : > { %p2614_p3 = pnand %p2613_p2, %p2612_p1  ;;  %p2619_p8 = por %p2618_p7, %p2617_p5 }
  0x2a   : > { %p2615_p4 = pneg %p2614_p3 }
  0x2c   : > { %p2620_p9 = pnand %p2619_p8, %p2615_p4 }
  0x2e   : > { %2623 = shalt.err (!%p2620_p9)
}
  0x2f   : > { %2533 = dma.hbm_to_vmem [thread:$0]  (!%p2917_p12), %s445_s20, 512, %s447_s12, %s434_s17  }
  0x30   : > { %p452_p1 = pnand %p2409_p13, %p451_p0 }
  0x32   : > { %455 = sbr.rel (%p452_p1) target bundleno = 1232 (0x4d0), region = 68 }
  0x37   : > { %s2938_s28 = sand.u32 1, %s2757_s16  }
  0x38   : > { %s2410_s27 = sshll.u32 %s2938_s28, 5  ;;  %s458_s14 = scalar_lea.sflag [#allocation4], %s2938_s28 }
  0x39   : > { %s2942_s21 = scalar_lea.vmem [#allocation3], %s2410_s27 }
  0x3a   : > { %2740 = dma.done.wait (%p2894_p6), %s458_s14, 512  }
  0x3b   : > { %2742 = vsyncadd (%p2894_p6), %s458_s14, 4294966784  ;;  %s2949_s12 = sshll.u32 %s2872_s11, 3  ;;  %v2767_v1 = vmov 0   ;;  %s4322_s0 = sld [smem:[#allocation28_spill]]  ;;  %vm600_vm0 = vcmask 1043456   ;;  %vm593_vm1 = vcmask 64512  }
  0x3c   : > { %2584 = vset.pattern.permute.xlu0 %v2767_v1  ;;  %2585 = vset.pattern.permute.xlu1 %v2767_v1  ;;  %p523_p12 = scmp.lt.s32.totalorder %s2949_s12, 31  ;;  %s4323_s3 = sld [smem:[#allocation31_spill]]  ;;  %v835_v28 = vld [vmem:[%s4241_s5 + $0x10] sm:$0xff]  ;;  %v836_v29 = vld [vmem:[%s4241_s5 + $0x18] sm:$0xff]  ;;  %v838_v31 = vld [vmem:[%s4241_s5 + $0x28] sm:$0xff]  ;;  %vm901_vm2 = vcmask 261120  }
  0x3d   : > { %2586 = vset.pattern.permute.xlu2 %v2767_v1  ;;  %s4324_s2 = sld [smem:[#allocation30_spill]]  ;;  %v839_v32 = vld [vmem:[%s4241_s5 + $0x30] sm:$0xff]  ;;  %v1899_v33 = vld [vmem:[%s4243_s7 + $0x38] sm:$0xff]  ;;  %v1896_v42 = vld [vmem:[%s4243_s7 + $0x20] sm:$0xff]  ;;  %s2413_s20 = sshll.u32 %s2938_s28, 8  ;;  %vm1940_vm3 = vcmask 523264  }
  0x3e   : > { %s524_s17 = scalar_select %p523_p12, %s2949_s12, 31  ;;  %v1898_v34 = vld [vmem:[%s4243_s7 + $0x30] sm:$0xff]  ;;  %v1895_v43 = vld [vmem:[%s4243_s7 + $0x18] sm:$0xff]  ;;  %v1893_v44 = vld [vmem:[%s4243_s7 + $0x8] sm:$0xff] }
  0x3f   : > { %v1892_v45 = vld [vmem:[%s4243_s7] sm:$0xff]  ;;  %v2028_v46 = vld [vmem:[%s4245_s9 + $0x30] sm:$0xff]  ;;  %v2027_v47 = vld [vmem:[%s4245_s9 + $0x28] sm:$0xff]  ;;  %s3634_s22 = scalar_lea.vmem [#allocation9], %s2413_s20  ;;  %s2412_s23 = sshll.u32 %s2938_s28, 6 }
  0x40   : > { %s2415_s19 = sshll.u32 %s524_s17, 2  ;;  %v2025_v48 = vld [vmem:[%s4245_s9 + $0x18] sm:$0xff]  ;;  %v2024_v49 = vld [vmem:[%s4245_s9 + $0x10] sm:$0xff]  ;;  %v2022_v50 = vld [vmem:[%s4245_s9] sm:$0xff]  ;;  %s3710_s25 = scalar_lea.vmem [#allocation7], %s2412_s23 }
  0x41   : > { %s2956_s15 = scalar_lea.vmem %s4322_s0, %s2415_s19  ;;  %v2144_v51 = vld [vmem:[#allocation2] sm:$0x1]  ;;  %s2234_s30 = scalar_lea.hbm %s4249_s13, %s2949_s12 }
  0x42   : > { %v541_v2 = vld [vmem:[%s4323_s3 + $0x10] sm:$0xff]  ;;  %v539_v3 = vld [vmem:[%s4323_s3] sm:$0xff]  ;;  %v532_v10 = vld [vmem:[%s2956_s15 + $0x8] sm:$0xff]  ;;  %s2237_s27 = sshll.u32 %s2234_s30, 4  ;;  %s2204_s14 = sand.u32 1, %s2872_s11   ;;  %s2238_s27 = int_to_ptr.hbm [resolvable:$true] %s2237_s27 }
  0x43   : > { %v531_v4 = vld [vmem:[%s2956_s15] sm:$0xff]  ;;  %555 = vperm.xlu0 %2584, %v541_v2   ;;  %545 = vperm.xlu1 %2585, %v539_v3   ;;  %v533_v9 = vld [vmem:[%s2956_s15 + $0x10] sm:$0xff]  ;;  %v579_v16 = vunpack.c.l.b16 %v532_v10  ;;  %v580_v17 = vunpack.c.h.b16 %v532_v10  ;;  %v542_v18 = vld [vmem:[%s4323_s3 + $0x18] sm:$0xff]  ;;  %s4171_s17 = scalar_lea.sflag [#allocation8], %s2204_s14  ;;  %s2653_s19 = sshra.s32 %s2238_s27, 4  ;;  %s2654_s19 = int_to_ptr.hbm [resolvable:$true] %s2653_s19 }
  0x44   : > { %v577_v5 = vunpack.c.l.b16 %v531_v4  ;;  %v578_v6 = vunpack.c.h.b16 %v531_v4  ;;  %v2972_v13 = vld [vmem:[%s4324_s2] sm:$0xff]  ;;  %v581_v14 = vunpack.c.l.b16 %v533_v9  ;;  %v582_v15 = vunpack.c.h.b16 %v533_v9  ;;  %v540_v19 = vld [vmem:[%s4323_s3 + $0x8] sm:$0xff]  ;;  %v534_v35 = vld [vmem:[%s2956_s15 + $0x18] sm:$0xff]  ;;  %s2235_s15 = sshll.u32 %s3710_s25, 4  ;;  %s2655_s20 = scalar_lea.hbm %s2654_s19, 64  ;;  %s2236_s15 = int_to_ptr.vmem [resolvable:$true] %s2235_s15 }
  0x45   : > { %v587_v22 = vpack.c.b16 %v579_v16, %v579_v16  ;;  %v588_v23 = vpack.c.b16 %v580_v17, %v580_v17  ;;  %v2516_v30 = vld [vmem:[%s4324_s2 + $0x8] sm:$0xff]  ;;  %v583_v36 = vunpack.c.l.b16 %v534_v35  ;;  %v584_v37 = vunpack.c.h.b16 %v534_v35  ;;  %p2656_p6 = scmp.ne.s32.totalorder %s2654_s19, %s2655_s20  ;;  %s2659_s0 = scalar_lea.hbm %s4249_s13, 256 }
  0x46   : > { %v585_v7 = vpack.c.b16 %v577_v5, %v577_v5  ;;  %v586_v8 = vpack.c.b16 %v578_v6, %v578_v6  ;;  %v589_v20 = vpack.c.b16 %v581_v14, %v581_v14  ;;  %v590_v21 = vpack.c.b16 %v582_v15, %v582_v15  ;;  %p2660_p2 = scmp.lt.s32.totalorder %s2654_s19, %s4249_s13  ;;  %p2661_p3 = scmp.lt.s32.totalorder %s2659_s0, %s2655_s20 }
  0x47   : > { %v608_v26 = vsel %vm600_vm0, %v587_v22, 0  ;;  %v611_v27 = vsel %vm600_vm0, %v588_v23, 0  ;;  %v591_v38 = vpack.c.b16 %v583_v36, %v583_v36  ;;  %v592_v39 = vpack.c.b16 %v584_v37, %v584_v37  ;;  %p2657_p13 = pnand %p2656_p6, %p2902_p10 }
  0x48   : > { %v602_v11 = vsel %vm600_vm0, %v585_v7, 0  ;;  %v605_v12 = vsel %vm600_vm0, %v586_v8, 0  ;;  %v614_v24 = vsel %vm600_vm0, %v589_v20, 0  ;;  %v617_v25 = vsel %vm600_vm0, %v590_v21, 0  ;;  %p2662_p4 = por %p2661_p3, %p2660_p2 }
  0x49   : > { %632 = vmatpush.bf16.msra.mxu3 %v602_v11  ;;  %651 = vmatpush.bf16.msra.mxu2 %v605_v12  ;;  %v620_v40 = vsel %vm600_vm0, %v591_v38, 0  ;;  %v623_v41 = vsel %vm600_vm0, %v592_v39, 0  ;;  %p2658_p0 = pneg %p2657_p13 }
  0x4a   : > { %708 = vmatpush.bf16.msra.mxu0 %v614_v24  ;;  %727 = vmatpush.bf16.msra.mxu1 %v617_v25 }
  0x4b   : > { %560 = vperm.xlu0 %2584, %v542_v18   ;;  %550 = vperm.xlu1 %2585, %v540_v19   ;;  %p2663_p5 = pnand %p2662_p4, %p2658_p0 }
  0x4c   : > { %2424 = vmatmul.msk.bf16.vlgmr.msra.gmra.mxu3 %vm593_vm1, %v2972_v13  ;;  %2426 = vmatmul.msk.bf16.vlgmr.msra.gmra.mxu2 %vm593_vm1, %v2972_v13 }
  0x4d   : > { %670 = vmatpush.bf16.msrb.mxu2 %v608_v26  ;;  %689 = vmatpush.bf16.msrb.mxu3 %v611_v27 }
  0x4e   : > { %2432 = vmatmul.msk.bf16.vlgmr.msra.gmra.mxu0 %vm593_vm1, %v2972_v13  ;;  %2434 = vmatmul.msk.bf16.vlgmr.msra.gmra.mxu1 %vm593_vm1, %v2972_v13 }
  0x51   : > { %746 = vmatpush.bf16.msra.mxu2 %v620_v40  ;;  %765 = vmatpush.bf16.msra.mxu3 %v623_v41 }
  0x53   : > { %853 = vperm.xlu0 %2584, %v835_v28   ;;  %858 = vperm.xlu1 %2585, %v836_v29  }
  0x5b   : > { %868 = vperm.xlu0 %2584, %v838_v31   ;;  %873 = vperm.xlu1 %2585, %v839_v32  }
  0x5c   : > { %2425 = vmatmul.msk.bf16.gmra.mxu3 %vm593_vm1, %v2516_v30  ;;  %2427 = vmatmul.msk.bf16.gmra.mxu2 %vm593_vm1, %v2516_v30 }
  0x5e   : > { %2433 = vmatmul.msk.bf16.gmra.mxu0 %vm593_vm1, %v2516_v30  ;;  %2435 = vmatmul.msk.bf16.gmra.mxu1 %vm593_vm1, %v2516_v30 }
  0x63   : > { %1937 = vperm.xlu0 %2584, %v1899_v33   ;;  %1932 = vperm.xlu1 %2585, %v1898_v34  }
  0x6b   : > { %1922 = vperm.xlu0 %2584, %v1896_v42   ;;  %1917 = vperm.xlu1 %2585, %v1895_v43  }
  0x6c   : > { %2428 = vmatmul.msk.bf16.vlgmr.msrb.gmra.mxu2 %vm593_vm1, %v2972_v13  ;;  %2430 = vmatmul.msk.bf16.vlgmr.msrb.gmra.mxu3 %vm593_vm1, %v2972_v13 }
  0x73   : > { %1907 = vperm.xlu0 %2584, %v1893_v44   ;;  %1902 = vperm.xlu1 %2585, %v1892_v45  }
  0x7b   : > { %2062 = vperm.xlu0 %2584, %v2028_v46   ;;  %2057 = vperm.xlu1 %2585, %v2027_v47  }
  0x7c   : > { %2429 = vmatmul.msk.bf16.gmra.mxu2 %vm593_vm1, %v2516_v30  ;;  %2431 = vmatmul.msk.bf16.gmra.mxu3 %vm593_vm1, %v2516_v30 }
  0x83   : > { %2047 = vperm.xlu0 %2584, %v2025_v48   ;;  %2042 = vperm.xlu1 %2585, %v2024_v49   ;;  %v3086_v48 = vld [vmem:[%s4240_s4] sm:$0xff] }
  0x8b   : > { %2032 = vperm.xlu0 %2584, %v2022_v50   ;;  %2147 = vperm.xlu1 %2585, %v2144_v51  }
  0x8c   : > { %2436 = vmatmul.msk.bf16.vlgmr.msra.gmra.mxu2 %vm593_vm1, %v2972_v13  ;;  %2438 = vmatmul.msk.bf16.vlgmr.msra.gmra.mxu3 %vm593_vm1, %v2972_v13 }
  0x9c   : > { %2437 = vmatmul.msk.bf16.gmra.mxu2 %vm593_vm1, %v2516_v30  ;;  %2439 = vmatmul.msk.bf16.gmra.mxu3 %vm593_vm1, %v2516_v30 }
  0xb5   : > { %v3059_v60 = vpop.permute.xlu0 %555  ;;  %v3061_v61 = vpop.permute.xlu1 %545 }
  0xbd   : > { %v3063_v2 = vpop.permute.xlu0 %560  ;;  %v3067_v7 = vpop.permute.xlu1 %550 }
  0xcb   : > { %v710_v52 = vpop.f32.mrf.mxu0  ;;  %v729_v53 = vpop.f32.mrf.mxu1 }
  0xcc   : > { %v711_v4 = vadd.f32 %v710_v52, %v3061_v61  ;;  %v730_v10 = vadd.f32 %v729_v53, %v3061_v61  ;;  %v833_v53 = vld [vmem:[%s4241_s5] sm:$0xff] }
  0xcd   : > { %843 = vperm.xlu2 %2586, %v833_v53  }
  0xce   : > { %v781_v38 = vmax.f32 %v711_v4, 0.0  ;;  %v782_v42 = vmax.f32 %v730_v10, 0.0 }
  0xcf   : > { %v634_v54 = vpop.f32.mrf.mxu3  ;;  %v653_v55 = vpop.f32.mrf.mxu2 }
  0xd0   : > { %v635_v18 = vadd.f32 %v634_v54, %v3061_v61  ;;  %v654_v19 = vadd.f32 %v653_v55, %v3061_v61 }
  0xd2   : > { %v777_v36 = vmax.f32 %v635_v18, 0.0  ;;  %v778_v37 = vmax.f32 %v654_v19, 0.0 }
  0xd3   : > { %v712_v56 = vpop.f32.mrf.mxu0  ;;  %v731_v57 = vpop.f32.mrf.mxu1 }
  0xd4   : > { %v713_v24 = vadd.f32 %v712_v56, %v3067_v7  ;;  %v732_v25 = vadd.f32 %v731_v57, %v3067_v7  ;;  %v3098_v56 = vld [vmem:[%s4240_s4 + $0x8] sm:$0xff] }
  0xd6   : > { %v789_v40 = vmax.f32 %v713_v24, 0.0  ;;  %v790_v44 = vmax.f32 %v732_v25, 0.0 }
  0xd7   : > { %v636_v58 = vpop.f32.mrf.mxu3  ;;  %v655_v59 = vpop.f32.mrf.mxu2 }
  0xd8   : > { %v637_v13 = vadd.f32 %v636_v58, %v3067_v7  ;;  %v656_v20 = vadd.f32 %v655_v59, %v3067_v7  ;;  %v813_v49 = vpack.c.bf16 %v789_v40, %v781_v38  ;;  %v814_v50 = vpack.c.bf16 %v790_v44, %v782_v42  ;;  %v834_v58 = vld [vmem:[%s4241_s5 + $0x8] sm:$0xff] }
  0xd9   : > { %848 = vperm.xlu2 %2586, %v834_v58   ;;  %v2023_v58 = vld [vmem:[%s4245_s9 + $0x8] sm:$0xff] }
  0xda   : > { %v785_v30 = vmax.f32 %v637_v13, 0.0  ;;  %v786_v34 = vmax.f32 %v656_v20, 0.0 }
  0xdb   : > { %v715_v62 = vpop.f32.mrf.mxu0  ;;  %v734_v63 = vpop.f32.mrf.mxu1 }
  0xdc   : > { %v716_v11 = vadd.f32 %v715_v62, %v3059_v60  ;;  %v735_v16 = vadd.f32 %v734_v63, %v3059_v60  ;;  %v809_v45 = vpack.c.bf16 %v785_v30, %v777_v36  ;;  %v810_v47 = vpack.c.bf16 %v786_v34, %v778_v37  ;;  %v840_v30 = vld [vmem:[%s4241_s5 + $0x38] sm:$0xff] }
  0xde   : > { %v797_v28 = vmax.f32 %v716_v11, 0.0  ;;  %v798_v32 = vmax.f32 %v735_v16, 0.0 }
  0xdf   : > { %v639_v0 = vpop.f32.mrf.mxu3  ;;  %v658_v1 = vpop.f32.mrf.mxu2 }
  0xe0   : > { %v640_v3 = vadd.f32 %v639_v0, %v3059_v60  ;;  %v659_v8 = vadd.f32 %v658_v1, %v3059_v60 }
  0xe2   : > { %v793_v22 = vmax.f32 %v640_v3, 0.0  ;;  %v794_v26 = vmax.f32 %v659_v8, 0.0 }
  0xe3   : > { %v717_v5 = vpop.f32.mrf.mxu0  ;;  %v736_v6 = vpop.f32.mrf.mxu1 }
  0xe4   : > { %v718_v12 = vadd.f32 %v717_v5, %v3063_v2  ;;  %v737_v17 = vadd.f32 %v736_v6, %v3063_v2 }
  0xe6   : > { %v805_v29 = vmax.f32 %v718_v12, 0.0  ;;  %v806_v33 = vmax.f32 %v737_v17, 0.0 }
  0xe7   : > { %v641_v9 = vpop.f32.mrf.mxu3  ;;  %v660_v15 = vpop.f32.mrf.mxu2 }
  0xe8   : > { %v642_v14 = vadd.f32 %v641_v9, %v3063_v2  ;;  %v661_v21 = vadd.f32 %v660_v15, %v3063_v2  ;;  %v821_v41 = vpack.c.bf16 %v805_v29, %v797_v28  ;;  %v822_v46 = vpack.c.bf16 %v806_v33, %v798_v32  ;;  %v3134_v28 = vld [vmem:[%s4240_s4 + $0x18] sm:$0xff] }
  0xea   : > { %v801_v23 = vmax.f32 %v642_v14, 0.0  ;;  %v802_v27 = vmax.f32 %v661_v21, 0.0 }
  0xec   : > { %v817_v31 = vpack.c.bf16 %v801_v23, %v793_v22  ;;  %v818_v35 = vpack.c.bf16 %v802_v27, %v794_v26  ;;  %v3118_v22 = vld [vmem:[%s4240_s4 + $0x10] sm:$0xff]  ;;  %v837_v23 = vld [vmem:[%s4241_s5 + $0x20] sm:$0xff] }
  0xed   : > { %863 = vperm.xlu2 %2586, %v837_v23  }
  0xee   : > { %920 = vmatpush.bf16.msrb.mxu0 %v817_v31  ;;  %949 = vmatpush.bf16.msrb.mxu1 %v818_v35 }
  0xef   : > { %v691_v39 = vpop.f32.mrf.mxu3  ;;  %v672_v43 = vpop.f32.mrf.mxu2 }
  0xf0   : > { %v692_v5 = vadd.f32 %v691_v39, %v3061_v61  ;;  %v673_v9 = vadd.f32 %v672_v43, %v3061_v61 }
  0xf2   : > { %921 = vmatpush.bf16.msrb.mxu0 %v809_v45  ;;  %950 = vmatpush.bf16.msrb.mxu1 %v810_v47  ;;  %v780_v16 = vmax.f32 %v692_v5, 0.0  ;;  %v779_v17 = vmax.f32 %v673_v9, 0.0  ;;  %v3218_v9 = vpop.permute.xlu0 %853 }
  0xf5   : > { %2456 = vmatmul.msk.bf16.vlgmr.msrb.gmra.mxu0 %vm901_vm2, %v3086_v48  ;;  %2460 = vmatmul.msk.bf16.vlgmr.msrb.gmra.mxu1 %vm901_vm2, %v3086_v48 }
  0xf6   : > { %1036 = vmatpush.bf16.msra.mxu0 %v821_v41  ;;  %1065 = vmatpush.bf16.msra.mxu1 %v822_v46 }
  0xf7   : > { %v693_v51 = vpop.f32.mrf.mxu3  ;;  %v674_v52 = vpop.f32.mrf.mxu2  ;;  %878 = vperm.xlu2 %2586, %v840_v30  }
  0xf8   : > { %v694_v63 = vadd.f32 %v693_v51, %v3067_v7  ;;  %v675_v3 = vadd.f32 %v674_v52, %v3067_v7  ;;  %v2029_v51 = vld [vmem:[%s4245_s9 + $0x38] sm:$0xff] }
  0xfa   : > { %1037 = vmatpush.bf16.msra.mxu0 %v813_v49  ;;  %1066 = vmatpush.bf16.msra.mxu1 %v814_v50  ;;  %v788_v12 = vmax.f32 %v694_v63, 0.0  ;;  %v787_v14 = vmax.f32 %v675_v3, 0.0 }
  0xfc   : > { %v812_v19 = vpack.c.bf16 %v788_v12, %v780_v16  ;;  %v811_v21 = vpack.c.bf16 %v787_v14, %v779_v17 }
  0xff   : > { %v696_v54 = vpop.f32.mrf.mxu3  ;;  %v677_v55 = vpop.f32.mrf.mxu2 }
 0x100   : > { %v697_v57 = vadd.f32 %v696_v54, %v3059_v60  ;;  %v678_v59 = vadd.f32 %v677_v55, %v3059_v60 }
 0x102   : > { %v796_v6 = vmax.f32 %v697_v57, 0.0  ;;  %v795_v10 = vmax.f32 %v678_v59, 0.0 }
 0x105   : > { %2457 = vmatmul.msk.bf16.gmra.mxu0 %vm901_vm2, %v3098_v56  ;;  %2461 = vmatmul.msk.bf16.gmra.mxu1 %vm901_vm2, %v3098_v56 }
 0x107   : > { %v698_v62 = vpop.f32.mrf.mxu3  ;;  %v679_v0 = vpop.f32.mrf.mxu2 }
 0x108   : > { %v699_v1 = vadd.f32 %v698_v62, %v3063_v2  ;;  %v680_v4 = vadd.f32 %v679_v0, %v3063_v2 }
 0x10a   : > { %v804_v8 = vmax.f32 %v699_v1, 0.0  ;;  %v803_v11 = vmax.f32 %v680_v4, 0.0 }
 0x10c   : > { %v820_v13 = vpack.c.bf16 %v804_v8, %v796_v6  ;;  %v819_v15 = vpack.c.bf16 %v803_v11, %v795_v10 }
 0x10e   : > { %1007 = vmatpush.bf16.msrb.mxu3 %v820_v13  ;;  %978 = vmatpush.bf16.msrb.mxu2 %v819_v15 }
 0x10f   : > { %v767_v18 = vpop.f32.mrf.mxu3  ;;  %v748_v20 = vpop.f32.mrf.mxu2 }
 0x110   : > { %v768_v38 = vadd.f32 %v767_v18, %v3061_v61  ;;  %v749_v41 = vadd.f32 %v748_v20, %v3061_v61  ;;  %v1897_v61 = vld [vmem:[%s4243_s7 + $0x28] sm:$0xff]  ;;  %v3230_v20 = vpop.permute.xlu1 %858 }
 0x111   : > { %1927 = vperm.xlu2 %2586, %v1897_v61  }
 0x112   : > { %1008 = vmatpush.bf16.msrb.mxu3 %v812_v19  ;;  %979 = vmatpush.bf16.msrb.mxu2 %v811_v21  ;;  %v784_v47 = vmax.f32 %v768_v38, 0.0  ;;  %v783_v49 = vmax.f32 %v749_v41, 0.0 }
 0x115   : > { %2458 = vmatmul.msk.bf16.gmra.mxu0 %vm901_vm2, %v3118_v22  ;;  %2468 = vmatmul.msk.bf16.vlgmr.msrb.gmra.mxu3 %vm901_vm2, %v3086_v48 }
 0x116   : > { %2462 = vmatmul.msk.bf16.gmra.mxu1 %vm901_vm2, %v3118_v22  ;;  %2464 = vmatmul.msk.bf16.vlgmr.msrb.gmra.mxu2 %vm901_vm2, %v3086_v48 }
 0x117   : > { %v769_v24 = vpop.f32.mrf.mxu3  ;;  %v750_v25 = vpop.f32.mrf.mxu2 }
 0x118   : > { %v770_v33 = vadd.f32 %v769_v24, %v3067_v7  ;;  %v751_v36 = vadd.f32 %v750_v25, %v3067_v7 }
 0x11a   : > { %v791_v45 = vmax.f32 %v751_v36, 0.0 }
 0x11c   : > { %v815_v7 = vpack.c.bf16 %v791_v45, %v783_v49 }
 0x11f   : > { %v772_v26 = vpop.f32.mrf.mxu3  ;;  %v753_v27 = vpop.f32.mrf.mxu2 }
 0x120   : > { %v773_v29 = vadd.f32 %v772_v26, %v3059_v60  ;;  %v754_v31 = vadd.f32 %v753_v27, %v3059_v60  ;;  %v792_v60 = vmax.f32 %v770_v33, 0.0 }
 0x122   : > { %v800_v39 = vmax.f32 %v773_v29, 0.0  ;;  %v799_v42 = vmax.f32 %v754_v31, 0.0  ;;  %v816_v50 = vpack.c.bf16 %v792_v60, %v784_v47 }
 0x125   : > { %2459 = vmatmul.msk.bf16.gmra.mxu0 %vm901_vm2, %v3134_v28  ;;  %2469 = vmatmul.msk.bf16.gmra.mxu3 %vm901_vm2, %v3098_v56 }
 0x126   : > { %2463 = vmatmul.msk.bf16.gmra.mxu1 %vm901_vm2, %v3134_v28  ;;  %2465 = vmatmul.msk.bf16.gmra.mxu2 %vm901_vm2, %v3098_v56 }
 0x127   : > { %v774_v32 = vpop.f32.mrf.mxu3  ;;  %v755_v34 = vpop.f32.mrf.mxu2 }
 0x128   : > { %v775_v35 = vadd.f32 %v774_v32, %v3063_v2  ;;  %v756_v37 = vadd.f32 %v755_v34, %v3063_v2  ;;  %v1894_v2 = vld [vmem:[%s4243_s7 + $0x10] sm:$0xff]  ;;  %v3199_v52 = vpop.permute.xlu2 %843 }
 0x129   : > { %1912 = vperm.xlu2 %2586, %v1894_v2  }
 0x12a   : > { %v808_v40 = vmax.f32 %v775_v35, 0.0  ;;  %v807_v43 = vmax.f32 %v756_v37, 0.0 }
 0x12c   : > { %v824_v44 = vpack.c.bf16 %v808_v40, %v800_v39  ;;  %v823_v46 = vpack.c.bf16 %v807_v43, %v799_v42  ;;  %v3245_v43 = vpop.permute.xlu0 %868 }
 0x12e   : > { %1123 = vmatpush.bf16.msra.mxu3 %v824_v44  ;;  %1094 = vmatpush.bf16.msra.mxu2 %v823_v46 }
 0x131   : > { %2067 = vperm.xlu2 %2586, %v2029_v51  }
 0x132   : > { %1124 = vmatpush.bf16.msra.mxu3 %v816_v50  ;;  %1095 = vmatpush.bf16.msra.mxu2 %v815_v7 }
 0x133   : > { %v3210_v62 = vpop.permute.xlu2 %848 }
 0x135   : > { %2470 = vmatmul.msk.bf16.gmra.mxu3 %vm901_vm2, %v3118_v22  ;;  %2472 = vmatmul.msk.bf16.vlgmr.msra.gmra.mxu0 %vm901_vm2, %v3086_v48 }
 0x136   : > { %2466 = vmatmul.msk.bf16.gmra.mxu2 %vm901_vm2, %v3118_v22  ;;  %2476 = vmatmul.msk.bf16.vlgmr.msra.gmra.mxu1 %vm901_vm2, %v3086_v48 }
 0x145   : > { %2471 = vmatmul.msk.bf16.gmra.mxu3 %vm901_vm2, %v3134_v28  ;;  %2473 = vmatmul.msk.bf16.gmra.mxu0 %vm901_vm2, %v3098_v56 }
 0x146   : > { %2467 = vmatmul.msk.bf16.gmra.mxu2 %vm901_vm2, %v3134_v28  ;;  %2477 = vmatmul.msk.bf16.gmra.mxu1 %vm901_vm2, %v3098_v56 }
 0x147   : > { %v3237_v31 = vpop.permute.xlu2 %863 }
 0x155   : > { %2474 = vmatmul.msk.bf16.gmra.mxu0 %vm901_vm2, %v3118_v22  ;;  %2484 = vmatmul.msk.bf16.vlgmr.msra.gmra.mxu3 %vm901_vm2, %v3086_v48 }
 0x156   : > { %2478 = vmatmul.msk.bf16.gmra.mxu1 %vm901_vm2, %v3118_v22  ;;  %2480 = vmatmul.msk.bf16.vlgmr.msra.gmra.mxu2 %vm901_vm2, %v3086_v48  ;;  %v2026_v48 = vld [vmem:[%s4245_s9 + $0x20] sm:$0xff] }
 0x157   : > { %2052 = vperm.xlu2 %2586, %v2026_v48  }
 0x15f   : > { %2037 = vperm.xlu2 %2586, %v2023_v58  }
 0x165   : > { %2475 = vmatmul.msk.bf16.gmra.mxu0 %vm901_vm2, %v3134_v28  ;;  %2485 = vmatmul.msk.bf16.gmra.mxu3 %vm901_vm2, %v3098_v56 }
 0x166   : > { %2479 = vmatmul.msk.bf16.gmra.mxu1 %vm901_vm2, %v3134_v28  ;;  %2481 = vmatmul.msk.bf16.gmra.mxu2 %vm901_vm2, %v3098_v56 }
 0x172   : > { %v923_v53 = vpop.f32.mrf.mxu0  ;;  %v952_v54 = vpop.f32.mrf.mxu1 }
 0x173   : > { %v924_v55 = vadd.f32 %v923_v53, %v3199_v52  ;;  %v953_v57 = vadd.f32 %v952_v54, %v3199_v52 }
 0x175   : > { %2486 = vmatmul.msk.bf16.gmra.mxu3 %vm901_vm2, %v3118_v22  ;;  %v1146_v56 = vmax.f32 %v924_v55, 0.0  ;;  %v1147_v59 = vmax.f32 %v953_v57, 0.0 }
 0x176   : > { %2482 = vmatmul.msk.bf16.gmra.mxu2 %vm901_vm2, %v3118_v22 }
 0x177   : > { %v3212_v63 = vpack.c.bf16 %v1147_v59, %v1146_v56  ;;  %v3257_v59 = vpop.permute.xlu1 %873 }
 0x179   : > { %4325 = vst [vmem:[#allocation18_spill] sm:$0xff] %v3212_v63  ;;  %v1243_v14 = vunpack.c.h.bf16 %v3212_v63 }
 0x17a   : > { %v925_v0 = vpop.f32.mrf.mxu0  ;;  %v954_v1 = vpop.f32.mrf.mxu1 }
 0x17b   : > { %v926_v3 = vadd.f32 %v925_v0, %v3210_v62  ;;  %v955_v4 = vadd.f32 %v954_v1, %v3210_v62 }
 0x17d   : > { %v1154_v5 = vmax.f32 %v926_v3, 0.0  ;;  %v1155_v6 = vmax.f32 %v955_v4, 0.0 }
 0x17f   : > { %v3216_v8 = vpack.c.bf16 %v1155_v6, %v1154_v5 }
 0x181   : > { %4326 = vst [vmem:[#allocation19_spill] sm:$0xff] %v3216_v8  ;;  %v1251_v15 = vunpack.c.h.bf16 %v3216_v8 }
 0x182   : > { %v928_v10 = vpop.f32.mrf.mxu0  ;;  %v957_v12 = vpop.f32.mrf.mxu1 }
 0x183   : > { %v929_v11 = vadd.f32 %v928_v10, %v3218_v9  ;;  %v958_v13 = vadd.f32 %v957_v12, %v3218_v9  ;;  %v1319_v19 = vmax.f32 %v1243_v14, %v1251_v15 }
 0x185   : > { %v1162_v16 = vmax.f32 %v929_v11, 0.0  ;;  %2487 = vmatmul.msk.bf16.gmra.mxu3 %vm901_vm2, %v3134_v28  ;;  %v1163_v17 = vmax.f32 %v958_v13, 0.0 }
 0x186   : > { %2483 = vmatmul.msk.bf16.gmra.mxu2 %vm901_vm2, %v3134_v28 }
 0x187   : > { %v3228_v18 = vpack.c.bf16 %v1163_v17, %v1162_v16 }
 0x189   : > { %v1259_v21 = vunpack.c.h.bf16 %v3228_v18 }
 0x18a   : > { %v930_v22 = vpop.f32.mrf.mxu0  ;;  %v959_v24 = vpop.f32.mrf.mxu1 }
 0x18b   : > { %v931_v23 = vadd.f32 %v930_v22, %v3230_v20  ;;  %v1320_v25 = vmax.f32 %v1319_v19, %v1259_v21  ;;  %v960_v26 = vadd.f32 %v959_v24, %v3230_v20 }
 0x18d   : > { %v1170_v27 = vmax.f32 %v931_v23, 0.0  ;;  %v1171_v29 = vmax.f32 %v960_v26, 0.0 }
 0x18f   : > { %v3235_v30 = vpack.c.bf16 %v1171_v29, %v1170_v27 }
 0x191   : > { %v1267_v28 = vunpack.c.h.bf16 %v3235_v30 }
 0x192   : > { %v933_v32 = vpop.f32.mrf.mxu0 }
 0x193   : > { %v934_v33 = vadd.f32 %v933_v32, %v3237_v31  ;;  %v962_v34 = vpop.f32.mrf.mxu1  ;;  %v1321_v35 = vmax.f32 %v1320_v25, %v1267_v28 }
 0x194   : > { %v963_v36 = vadd.f32 %v962_v34, %v3237_v31 }
 0x195   : > { %v1178_v37 = vmax.f32 %v934_v33, 0.0 }
 0x196   : > { %v1179_v38 = vmax.f32 %v963_v36, 0.0 }
 0x198   : > { %v3242_v39 = vpack.c.bf16 %v1179_v38, %v1178_v37  ;;  %v1010_v40 = vpop.f32.mrf.mxu3 }
 0x199   : > { %v981_v41 = vpop.f32.mrf.mxu2  ;;  %v1011_v42 = vadd.f32 %v1010_v40, %v3199_v52  ;;  %v4260_v40 = vunpack.c.l.bf16 %v3212_v63 }
 0x19a   : > { %v1275_v60 = vunpack.c.h.bf16 %v3242_v39  ;;  %v982_v44 = vadd.f32 %v981_v41, %v3199_v52  ;;  %v935_v45 = vpop.f32.mrf.mxu0  ;;  %v4262_v41 = vunpack.c.l.bf16 %v3216_v8 }
 0x19b   : > { %v1149_v46 = vmax.f32 %v1011_v42, 0.0  ;;  %v936_v47 = vadd.f32 %v935_v45, %v3245_v43  ;;  %v964_v49 = vpop.f32.mrf.mxu1 }
 0x19c   : > { %v1322_v50 = vmax.f32 %v1321_v35, %v1275_v60  ;;  %v1148_v7 = vmax.f32 %v982_v44, 0.0  ;;  %v965_v2 = vadd.f32 %v964_v49, %v3245_v43  ;;  %v3280_v60 = vpop.permute.xlu2 %878 }
 0x19d   : > { %v1186_v61 = vmax.f32 %v936_v47, 0.0 }
 0x19e   : > { %v3251_v51 = vpack.c.bf16 %v1149_v46, %v1148_v7  ;;  %v1187_v48 = vmax.f32 %v965_v2, 0.0  ;;  %v4264_v7 = vunpack.c.l.bf16 %v3228_v18 }
 0x1a0   : > { %4327 = vst [vmem:[#allocation20_spill] sm:$0xff] %v3251_v51  ;;  %v1012_v53 = vpop.f32.mrf.mxu3  ;;  %v3253_v54 = vpack.c.bf16 %v1187_v48, %v1186_v61  ;;  %v1245_v14 = vunpack.c.h.bf16 %v3251_v51  ;;  %v1306_v61 = vmax.f32 %v4260_v40, %v4262_v41 }
 0x1a1   : > { %v983_v55 = vpop.f32.mrf.mxu2  ;;  %v1013_v57 = vadd.f32 %v1012_v53, %v3210_v62  ;;  %v4266_v53 = vunpack.c.l.bf16 %v3235_v30 }
 0x1a2   : > { %v984_v58 = vadd.f32 %v983_v55, %v3210_v62  ;;  %v938_v56 = vpop.f32.mrf.mxu0  ;;  %v1283_v0 = vunpack.c.h.bf16 %v3253_v54 }
 0x1a3   : > { %v1157_v1 = vmax.f32 %v1013_v57, 0.0  ;;  %v967_v3 = vpop.f32.mrf.mxu1  ;;  %v939_v5 = vadd.f32 %v938_v56, %v3257_v59 }
 0x1a4   : > { %v1156_v4 = vmax.f32 %v984_v58, 0.0  ;;  %v968_v6 = vadd.f32 %v967_v3, %v3257_v59  ;;  %v1323_v10 = vmax.f32 %v1322_v50, %v1283_v0  ;;  %v1307_v3 = vmax.f32 %v1306_v61, %v4264_v7 }
 0x1a5   : > { %v1194_v12 = vmax.f32 %v939_v5, 0.0 }
 0x1a6   : > { %v3262_v11 = vpack.c.bf16 %v1157_v1, %v1156_v4  ;;  %v1195_v13 = vmax.f32 %v968_v6, 0.0  ;;  %v4268_v4 = vunpack.c.l.bf16 %v3242_v39 }
 0x1a8   : > { %4328 = vst [vmem:[#allocation21_spill] sm:$0xff] %v3262_v11  ;;  %v1253_v15 = vunpack.c.h.bf16 %v3262_v11  ;;  %v3266_v16 = vpack.c.bf16 %v1195_v13, %v1194_v12  ;;  %v1015_v17 = vpop.f32.mrf.mxu3  ;;  %v1308_v12 = vmax.f32 %v1307_v3, %v4266_v53  ;;  %v4270_v13 = vunpack.c.l.bf16 %v3253_v54 }
 0x1a9   : > { %v986_v19 = vpop.f32.mrf.mxu2  ;;  %v1016_v21 = vadd.f32 %v1015_v17, %v3218_v9 }
 0x1aa   : > { %v1345_v22 = vmax.f32 %v1245_v14, %v1253_v15  ;;  %v940_v23 = vpop.f32.mrf.mxu0  ;;  %v1291_v24 = vunpack.c.h.bf16 %v3266_v16  ;;  %v987_v25 = vadd.f32 %v986_v19, %v3218_v9  ;;  %v1309_v17 = vmax.f32 %v1308_v12, %v4268_v4 }
 0x1ab   : > { %v1165_v26 = vmax.f32 %v1016_v21, 0.0  ;;  %v969_v27 = vpop.f32.mrf.mxu1  ;;  %v941_v47 = vadd.f32 %v940_v23, %v3280_v60  ;;  %v4272_v19 = vunpack.c.l.bf16 %v3266_v16 }
 0x1ac   : > { %v1324_v29 = vmax.f32 %v1323_v10, %v1291_v24  ;;  %v1164_v28 = vmax.f32 %v987_v25, 0.0  ;;  %v970_v49 = vadd.f32 %v969_v27, %v3280_v60  ;;  %v1310_v23 = vmax.f32 %v1309_v17, %v4270_v13 }
 0x1ad   : > { %v1202_v58 = vmax.f32 %v941_v47, 0.0 }
 0x1ae   : > { %v3271_v32 = vpack.c.bf16 %v1165_v26, %v1164_v28  ;;  %v1203_v56 = vmax.f32 %v970_v49, 0.0 }
 0x1b0   : > { %v1017_v33 = vpop.f32.mrf.mxu3  ;;  %v1261_v34 = vunpack.c.h.bf16 %v3271_v32  ;;  %v3307_v14 = vpack.c.bf16 %v1203_v56, %v1202_v58  ;;  %v4263_v12 = vunpack.c.l.bf16 %v3271_v32 }
 0x1b1   : > { %v988_v35 = vpop.f32.mrf.mxu2  ;;  %v1018_v36 = vadd.f32 %v1017_v33, %v3230_v20 }
 0x1b2   : > { %v989_v37 = vadd.f32 %v988_v35, %v3230_v20  ;;  %v3276_v38 = vpop.f32.mrf.mxu0  ;;  %v1346_v42 = vmax.f32 %v1345_v22, %v1261_v34  ;;  %v4274_v25 = vunpack.c.l.bf16 %v3307_v14  ;;  %v1299_v26 = vunpack.c.h.bf16 %v3307_v14 }
 0x1b3   : > { %v1173_v44 = vmax.f32 %v1018_v36, 0.0  ;;  %v3282_v45 = vpop.f32.mrf.mxu1  ;;  %v1311_v36 = vmax.f32 %v1310_v23, %v4272_v19 }
 0x1b4   : > { %v1172_v46 = vmax.f32 %v989_v37, 0.0  ;;  %v1069_v53 = vadd.f32 %v3282_v45, %v3199_v52 }
 0x1b6   : > { %v3286_v50 = vpack.c.bf16 %v1173_v44, %v1172_v46  ;;  %v1325_v44 = vmax.f32 %v1324_v29, %v1299_v26 }
 0x1b8   : > { %v1269_v2 = vunpack.c.h.bf16 %v3286_v50  ;;  %v1020_v48 = vpop.f32.mrf.mxu3  ;;  %v4265_v26 = vunpack.c.l.bf16 %v3286_v50 }
 0x1b9   : > { %v991_v55 = vpop.f32.mrf.mxu2  ;;  %v1021_v57 = vadd.f32 %v1020_v48, %v3237_v31 }
 0x1ba   : > { %v1347_v0 = vmax.f32 %v1346_v42, %v1269_v2  ;;  %v3296_v1 = vpop.f32.mrf.mxu0  ;;  %v992_v6 = vadd.f32 %v991_v55, %v3237_v31  ;;  %v1312_v42 = vmax.f32 %v1311_v36, %v4274_v25 }
 0x1bb   : > { %v3301_v5 = vpop.f32.mrf.mxu1  ;;  %v1181_v10 = vmax.f32 %v1021_v57, 0.0  ;;  %v1326_v57 = vrot.slane %v1325_v44, 4 }
 0x1bc   : > { %v1180_v15 = vmax.f32 %v992_v6, 0.0  ;;  %v1313_v55 = vrot.slane %v1312_v42, 4 }
 0x1bd   : > { %v1327_v23 = vmax.f32 %v1325_v44, %v1326_v57 }
 0x1be   : > { %v3312_v21 = vpack.c.bf16 %v1181_v10, %v1180_v15  ;;  %v4259_v10 = vunpack.c.l.bf16 %v3251_v51 }
 0x1bf   : > { %v1328_v44 = vrot.slane %v1327_v23, 2 }
 0x1c0   : > { %v1022_v22 = vpop.f32.mrf.mxu3  ;;  %v1277_v27 = vunpack.c.h.bf16 %v3312_v21 }
 0x1c1   : > { %v993_v24 = vpop.f32.mrf.mxu2  ;;  %v1023_v28 = vadd.f32 %v1022_v22, %v3245_v43  ;;  %v1314_v22 = vmax.f32 %v1312_v42, %v1313_v55 }
 0x1c2   : > { %v3320_v33 = vpop.f32.mrf.mxu0  ;;  %v994_v34 = vadd.f32 %v993_v24, %v3245_v43  ;;  %v1348_v37 = vmax.f32 %v1347_v0, %v1277_v27  ;;  %v4261_v0 = vunpack.c.l.bf16 %v3262_v11 }
 0x1c3   : > { %v3323_v35 = vpop.f32.mrf.mxu1  ;;  %v1189_v47 = vmax.f32 %v1023_v28, 0.0  ;;  %v1315_v42 = vrot.slane %v1314_v22, 2  ;;  %v1045_v13 = vadd.f32 %v3320_v33, %v3218_v9 }
 0x1c4   : > { %v1188_v46 = vmax.f32 %v994_v34, 0.0  ;;  %v1332_v24 = vmax.f32 %v4259_v10, %v4261_v0  ;;  %v4267_v34 = vunpack.c.l.bf16 %v3312_v21 }
 0x1c6   : > { %v3329_v49 = vpack.c.bf16 %v1189_v47, %v1188_v46  ;;  %v1333_v28 = vmax.f32 %v1332_v24, %v4263_v12  ;;  %v1316_v24 = vmax.f32 %v1314_v22, %v1315_v42 }
 0x1c8   : > { %v1025_v61 = vpop.f32.mrf.mxu3  ;;  %v1285_v58 = vunpack.c.h.bf16 %v3329_v49  ;;  %v1317_v22 = vrot.slane %v1316_v24, 1 }
 0x1c9   : > { %v996_v2 = vpop.f32.mrf.mxu2  ;;  %v1026_v48 = vadd.f32 %v1025_v61, %v3257_v59  ;;  %v1334_v61 = vmax.f32 %v1333_v28, %v4265_v26  ;;  %v1040_v26 = vadd.f32 %v3276_v38, %v3199_v52 }
 0x1ca   : > { %v997_v56 = vadd.f32 %v996_v2, %v3257_v59  ;;  %v3334_v3 = vpop.f32.mrf.mxu0  ;;  %v1349_v29 = vmax.f32 %v1348_v37, %v1285_v58  ;;  %v4269_v2 = vunpack.c.l.bf16 %v3329_v49  ;;  %v1318_v12 = vmax.f32 %v1316_v24, %v1317_v22 }
 0x1cb   : > { %v3337_v6 = vpop.f32.mrf.mxu1  ;;  %v1197_v17 = vmax.f32 %v1026_v48, 0.0  ;;  %v1335_v58 = vmax.f32 %v1334_v61, %v4267_v34  ;;  %v1071_v24 = vadd.f32 %v3301_v5, %v3210_v62  ;;  %v1150_v38 = vmax.f32 %v1040_v26, 0.0 }
 0x1cc   : > { %v1196_v15 = vmax.f32 %v997_v56, 0.0  ;;  %v1047_v26 = vadd.f32 %v3334_v3, %v3230_v20 }
 0x1cd   : > { %v1336_v28 = vmax.f32 %v1335_v58, %v4269_v2 }
 0x1ce   : > { %v3349_v36 = vpack.c.bf16 %v1197_v17, %v1196_v15 }
 0x1d0   : > { %v1027_v27 = vpop.f32.mrf.mxu3  ;;  %v4271_v56 = vunpack.c.l.bf16 %v3349_v36  ;;  %v1293_v15 = vunpack.c.h.bf16 %v3349_v36 }
 0x1d1   : > { %v998_v37 = vpop.f32.mrf.mxu2  ;;  %v1028_v46 = vadd.f32 %v1027_v27, %v3280_v60  ;;  %v1329_v27 = vmax.f32 %v1327_v23, %v1328_v44 }
 0x1d2   : > { %v3352_v47 = vpop.f32.mrf.mxu0  ;;  %v999_v48 = vadd.f32 %v998_v37, %v3280_v60  ;;  %v1337_v37 = vmax.f32 %v1336_v28, %v4271_v56 }
 0x1d3   : > { %v1205_v55 = vmax.f32 %v1028_v46, 0.0  ;;  %v3358_v57 = vpop.f32.mrf.mxu1  ;;  %v1350_v46 = vmax.f32 %v1349_v29, %v1293_v15  ;;  %v1330_v23 = vrot.slane %v1329_v27, 1 }
 0x1d4   : > { %v1204_v17 = vmax.f32 %v999_v48, 0.0 }
 0x1d5   : > { %v1331_v7 = vmax.f32 %v1329_v27, %v1330_v23 }
 0x1d6   : > { %v3366_v10 = vpack.c.bf16 %v1205_v55, %v1204_v17 }
 0x1d7   : > { %v3390_v27 = vpack.c.bf16 %v1331_v7, %v1318_v12 }
 0x1d8   : > { %v3368_v40 = vpop.f32.mrf.mxu3  ;;  %v4273_v61 = vunpack.c.l.bf16 %v3366_v10  ;;  %v1301_v0 = vunpack.c.h.bf16 %v3366_v10 }
 0x1d9   : > { %v3374_v41 = vpop.f32.mrf.mxu2  ;;  %v1414_v5 = vunpack.c.l.bf16 %v3390_v27  ;;  %v4277_v7 = vunpack.c.h.bf16 %v3390_v27 }
 0x1da   : > { %v1051_v48 = vpop.f32.mrf.mxu0  ;;  %v1338_v42 = vmax.f32 %v1337_v37, %v4273_v61  ;;  %v1351_v44 = vmax.f32 %v1350_v46, %v1301_v0  ;;  %v1042_v0 = vadd.f32 %v3296_v1, %v3210_v62  ;;  %v1074_v1 = vadd.f32 %v3323_v35, %v3218_v9 }
 0x1db   : > { %v1080_v55 = vpop.f32.mrf.mxu1  ;;  %v1422_v3 = vmax.f32 %v1414_v5, %v4277_v7 }
 0x1dc   : > { %v1339_v58 = vrot.slane %v1338_v42, 4  ;;  %v1352_v17 = vrot.slane %v1351_v44, 4 }
 0x1de   : > { %v1340_v28 = vmax.f32 %v1338_v42, %v1339_v58  ;;  %v1353_v29 = vmax.f32 %v1351_v44, %v1352_v17  ;;  %v1151_v42 = vmax.f32 %v1069_v53, 0.0  ;;  %v1158_v58 = vmax.f32 %v1042_v0, 0.0 }
 0x1df   : > { %v1159_v17 = vmax.f32 %v1071_v24, 0.0  ;;  %v1076_v53 = vadd.f32 %v3337_v6, %v3230_v20  ;;  %v1166_v0 = vmax.f32 %v1045_v13, 0.0  ;;  %v1167_v24 = vmax.f32 %v1074_v1, 0.0 }
 0x1e0   : > { %v3378_v15 = vpop.f32.mrf.mxu3  ;;  %v1341_v34 = vrot.slane %v1340_v28, 2  ;;  %v1354_v4 = vrot.slane %v1353_v29, 2 }
 0x1e1   : > { %v3384_v2 = vpop.f32.mrf.mxu2  ;;  %v3410_v35 = vpack.c.bf16 %v1159_v17, %v1158_v58  ;;  %v3428_v1 = vpack.c.bf16 %v1167_v24, %v1166_v0 }
 0x1e2   : > { %v1342_v37 = vmax.f32 %v1340_v28, %v1341_v34  ;;  %v1355_v46 = vmax.f32 %v1353_v29, %v1354_v4  ;;  %v1054_v22 = vpop.f32.mrf.mxu0  ;;  %v3404_v28 = vpack.c.bf16 %v1151_v42, %v1150_v38  ;;  %v1174_v38 = vmax.f32 %v1047_v26, 0.0 }
 0x1e3   : > { %v1083_v23 = vpop.f32.mrf.mxu1  ;;  %4330 = vst [vmem:[#allocation23_spill] sm:$0xff] %v3410_v35  ;;  %v1175_v42 = vmax.f32 %v1076_v53, 0.0  ;;  %v4279_v17 = vunpack.c.l.bf16 %v3410_v35  ;;  %v1255_v56 = vunpack.c.h.bf16 %v3410_v35  ;;  %v4338_v35 = vunpack.c.l.bf16 %v3307_v14 }
 0x1e4   : > { %v1343_v44 = vrot.slane %v1342_v37, 1  ;;  %v1356_v45 = vrot.slane %v1355_v46, 1  ;;  %4329 = vst [vmem:[#allocation22_spill] sm:$0xff] %v3404_v28  ;;  %v4278_v58 = vunpack.c.l.bf16 %v3404_v28 }
 0x1e5   : > { %v3438_v19 = vpack.c.bf16 %v1175_v42, %v1174_v38 }
 0x1e6   : > { %v1344_v12 = vmax.f32 %v1342_v37, %v1343_v44  ;;  %v1357_v4 = vmax.f32 %v1355_v46, %v1356_v45  ;;  %v1050_v37 = vadd.f32 %v3352_v47, %v3237_v31  ;;  %v1079_v46 = vadd.f32 %v3358_v57, %v3237_v31 }
 0x1e7   : > { %v1052_v45 = vadd.f32 %v1051_v48, %v3245_v43  ;;  %v1081_v47 = vadd.f32 %v1080_v55, %v3245_v43  ;;  %v1084_v48 = vadd.f32 %v1083_v23, %v3257_v59  ;;  %v1247_v55 = vunpack.c.h.bf16 %v3404_v28 }
 0x1e8   : > { %v3402_v34 = vpop.f32.mrf.mxu3  ;;  %v3406_v33 = vpack.c.bf16 %v1357_v4, %v1344_v12  ;;  %v1182_v12 = vmax.f32 %v1050_v37, 0.0  ;;  %v1183_v53 = vmax.f32 %v1079_v46, 0.0  ;;  %v4280_v23 = vunpack.c.l.bf16 %v3428_v1 }
 0x1e9   : > { %v3408_v29 = vpop.f32.mrf.mxu2  ;;  %v1190_v24 = vmax.f32 %v1052_v45, 0.0  ;;  %v1191_v37 = vmax.f32 %v1081_v47, 0.0  ;;  %v1199_v38 = vmax.f32 %v1084_v48, 0.0  ;;  %v1371_v42 = vmax.f32 %v1247_v55, %v1255_v56 }
 0x1ea   : > { %v4276_v6 = vunpack.c.l.bf16 %v3406_v33  ;;  %v4275_v44 = vunpack.c.h.bf16 %v3406_v33  ;;  %v1056_v4 = vpop.f32.mrf.mxu0  ;;  %v3447_v46 = vpack.c.bf16 %v1183_v53, %v1182_v12  ;;  %v1263_v45 = vunpack.c.h.bf16 %v3428_v1 }
 0x1eb   : > { %v1085_v57 = vpop.f32.mrf.mxu1  ;;  %v1057_v61 = vadd.f32 %v1056_v4, %v3280_v60  ;;  %v4281_v47 = vunpack.c.l.bf16 %v3438_v19  ;;  %v3451_v4 = vpack.c.bf16 %v1191_v37, %v1190_v24  ;;  %v1271_v7 = vunpack.c.h.bf16 %v3438_v19 }
 0x1ec   : > { %v1423_v13 = vmax.f32 %v1422_v3, %v4276_v6  ;;  %v1055_v3 = vadd.f32 %v1054_v22, %v3257_v59  ;;  %v1086_v25 = vadd.f32 %v1085_v57, %v3280_v60  ;;  %v1358_v22 = vmax.f32 %v4278_v58, %v4279_v17 }
 0x1ed   : > { %v1206_v57 = vmax.f32 %v1057_v61, 0.0  ;;  %v4282_v17 = vunpack.c.l.bf16 %v3447_v46  ;;  %v1372_v53 = vmax.f32 %v1371_v42, %v1263_v45  ;;  %v1279_v56 = vunpack.c.h.bf16 %v3447_v46 }
 0x1ee   : > { %v3432_v26 = vmax.f32 %v1423_v13, %v4275_v44  ;;  %v1198_v44 = vmax.f32 %v1055_v3, 0.0  ;;  %v1207_v6 = vmax.f32 %v1086_v25, 0.0  ;;  %v1359_v58 = vmax.f32 %v1358_v22, %v4280_v23 }
 0x1ef   : > { %v4283_v55 = vunpack.c.l.bf16 %v3451_v4  ;;  %v1373_v24 = vmax.f32 %v1372_v53, %v1271_v7  ;;  %v1287_v37 = vunpack.c.h.bf16 %v3451_v4  ;;  %v1129_v7 = vadd.f32 %v3378_v15, %v3210_v62 }
 0x1f0   : > { %v1133_v0 = vpop.f32.mrf.mxu3  ;;  %v3457_v12 = vpack.c.bf16 %v1199_v38, %v1198_v44  ;;  %v1360_v48 = vmax.f32 %v1359_v58, %v4281_v47  ;;  %v3463_v61 = vpack.c.bf16 %v1207_v6, %v1206_v57  ;;  %v1098_v44 = vadd.f32 %v3374_v41, %v3199_v52 }
 0x1f1   : > { %v1104_v13 = vpop.f32.mrf.mxu2  ;;  %v1127_v38 = vadd.f32 %v3368_v40, %v3199_v52  ;;  %v1374_v58 = vmax.f32 %v1373_v24, %v1279_v56  ;;  %v1100_v6 = vadd.f32 %v3384_v2, %v3210_v62  ;;  %v1103_v2 = vadd.f32 %v3408_v29, %v3218_v9 }
 0x1f2   : > { %v1361_v22 = vmax.f32 %v1360_v48, %v4282_v17  ;;  %v4291_v42 = vunpack.c.l.bf16 %v3457_v12  ;;  %v1295_v45 = vunpack.c.h.bf16 %v3457_v12  ;;  %v4292_v53 = vunpack.c.l.bf16 %v3463_v61 }
 0x1f3   : > { %v1375_v41 = vmax.f32 %v1374_v58, %v1287_v37  ;;  %v1303_v48 = vunpack.c.h.bf16 %v3463_v61  ;;  %v1153_v52 = vmax.f32 %v1127_v38, 0.0  ;;  %v1132_v62 = vadd.f32 %v3402_v34, %v3218_v9 }
 0x1f4   : > { %v1362_v57 = vmax.f32 %v1361_v22, %v4283_v55  ;;  %v1152_v15 = vmax.f32 %v1098_v44, 0.0  ;;  %v1160_v56 = vmax.f32 %v1100_v6, 0.0  ;;  %v1161_v24 = vmax.f32 %v1129_v7, 0.0 }
 0x1f5   : > { %v1376_v23 = vmax.f32 %v1375_v41, %v1295_v45  ;;  %v1105_v58 = vadd.f32 %v1104_v13, %v3230_v20  ;;  %v1134_v38 = vadd.f32 %v1133_v0, %v3230_v20  ;;  %v1168_v17 = vmax.f32 %v1103_v2, 0.0 }
 0x1f6   : > { %v1363_v40 = vmax.f32 %v1362_v57, %v4291_v42  ;;  %v1169_v55 = vmax.f32 %v1132_v62, 0.0  ;;  %v3494_v34 = vpack.c.bf16 %v1153_v52, %v1152_v15  ;;  %v3496_v44 = vpack.c.bf16 %v1161_v24, %v1160_v56 }
 0x1f7   : > { %v1377_v57 = vmax.f32 %v1376_v23, %v1303_v48  ;;  %v1176_v7 = vmax.f32 %v1105_v58, 0.0  ;;  %v1177_v45 = vmax.f32 %v1134_v38, 0.0 }
 0x1f8   : > { %v1136_v3 = vpop.f32.mrf.mxu3  ;;  %v1364_v37 = vmax.f32 %v1363_v40, %v4292_v53  ;;  %4331 = vst [vmem:[#allocation24_spill] sm:$0xff] %v3494_v34  ;;  %v3500_v0 = vpack.c.bf16 %v1169_v55, %v1168_v17  ;;  %v1257_v52 = vunpack.c.h.bf16 %v3496_v44  ;;  %v1249_v55 = vunpack.c.h.bf16 %v3494_v34 }
 0x1f9   : > { %v1107_v25 = vpop.f32.mrf.mxu2  ;;  %v1137_v9 = vadd.f32 %v1136_v3, %v3237_v31  ;;  %v1378_v41 = vrot.slane %v1377_v57, 4  ;;  %v3505_v2 = vpack.c.bf16 %v1177_v45, %v1176_v7 }
 0x1fa   : > { %v1108_v29 = vadd.f32 %v1107_v25, %v3237_v31  ;;  %v1365_v6 = vrot.slane %v1364_v37, 4  ;;  %v4284_v25 = vunpack.c.l.bf16 %v3494_v34  ;;  %v4285_v31 = vunpack.c.l.bf16 %v3496_v44 }
 0x1fb   : > { %v1185_v48 = vmax.f32 %v1137_v9, 0.0  ;;  %v4286_v24 = vunpack.c.l.bf16 %v3500_v0 }
 0x1fc   : > { %v1184_v23 = vmax.f32 %v1108_v29, 0.0  ;;  %v1366_v40 = vmax.f32 %v1364_v37, %v1365_v6  ;;  %v1384_v37 = vmax.f32 %v4284_v25, %v4285_v31  ;;  %v4287_v6 = vunpack.c.l.bf16 %v3505_v2 }
 0x1fe   : > { %v3512_v58 = vpack.c.bf16 %v1185_v48, %v1184_v23  ;;  %v1367_v9 = vrot.slane %v1366_v40, 2 }
 0x200   : > { %v1138_v22 = vpop.f32.mrf.mxu3  ;;  %v1281_v23 = vunpack.c.h.bf16 %v3512_v58 }
 0x201   : > { %v1109_v47 = vpop.f32.mrf.mxu2  ;;  %v1139_v20 = vadd.f32 %v1138_v22, %v3245_v43  ;;  %v1265_v22 = vunpack.c.h.bf16 %v3500_v0 }
 0x202   : > { %v1110_v13 = vadd.f32 %v1109_v47, %v3245_v43  ;;  %v1379_v47 = vmax.f32 %v1377_v57, %v1378_v41  ;;  %v1397_v57 = vmax.f32 %v1249_v55, %v1257_v52  ;;  %v1385_v41 = vmax.f32 %v1384_v37, %v4286_v24 }
 0x203   : > { %v1193_v43 = vmax.f32 %v1139_v20, 0.0  ;;  %v4288_v20 = vunpack.c.l.bf16 %v3512_v58  ;;  %v1368_v52 = vmax.f32 %v1366_v40, %v1367_v9 }
 0x204   : > { %v1192_v56 = vmax.f32 %v1110_v13, 0.0  ;;  %v1380_v7 = vrot.slane %v1379_v47, 2  ;;  %v1398_v13 = vmax.f32 %v1397_v57, %v1265_v22 }
 0x206   : > { %v3520_v45 = vpack.c.bf16 %v1193_v43, %v1192_v56  ;;  %v1381_v43 = vmax.f32 %v1379_v47, %v1380_v7 }
 0x208   : > { %v1141_v3 = vpop.f32.mrf.mxu3  ;;  %v4289_v55 = vunpack.c.l.bf16 %v3520_v45  ;;  %v1289_v22 = vunpack.c.h.bf16 %v3520_v45 }
 0x209   : > { %v1112_v62 = vpop.f32.mrf.mxu2  ;;  %v1142_v15 = vadd.f32 %v1141_v3, %v3257_v59 }
 0x20a   : > { %v1113_v17 = vadd.f32 %v1112_v62, %v3257_v59  ;;  %v1273_v59 = vunpack.c.h.bf16 %v3505_v2  ;;  %v1386_v62 = vmax.f32 %v1385_v41, %v4287_v6  ;;  %v1369_v41 = vrot.slane %v1368_v52, 1 }
 0x20b   : > { %v1201_v29 = vmax.f32 %v1142_v15, 0.0 }
 0x20c   : > { %v1200_v38 = vmax.f32 %v1113_v17, 0.0  ;;  %v1399_v15 = vmax.f32 %v1398_v13, %v1273_v59  ;;  %v1382_v13 = vrot.slane %v1381_v43, 1 }
 0x20e   : > { %v3526_v48 = vpack.c.bf16 %v1201_v29, %v1200_v38  ;;  %v1387_v38 = vmax.f32 %v1386_v62, %v4288_v20  ;;  %v1400_v57 = vmax.f32 %v1399_v15, %v1281_v23  ;;  %v1370_v15 = vmax.f32 %v1368_v52, %v1369_v41 }
 0x210   : > { %v1143_v3 = vpop.f32.mrf.mxu3  ;;  %v4290_v40 = vunpack.c.l.bf16 %v3526_v48  ;;  %v1297_v9 = vunpack.c.h.bf16 %v3526_v48  ;;  %v1388_v47 = vmax.f32 %v1387_v38, %v4289_v55  ;;  %v1401_v7 = vmax.f32 %v1400_v57, %v1289_v22 }
 0x211   : > { %v1114_v17 = vpop.f32.mrf.mxu2  ;;  %v1144_v56 = vadd.f32 %v1143_v3, %v3280_v60 }
 0x212   : > { %v1115_v37 = vadd.f32 %v1114_v17, %v3280_v60  ;;  %v1389_v60 = vmax.f32 %v1388_v47, %v4290_v40  ;;  %v1402_v17 = vmax.f32 %v1401_v7, %v1297_v9 }
 0x213   : > { %v1209_v29 = vmax.f32 %v1144_v56, 0.0  ;;  %v1383_v56 = vmax.f32 %v1381_v43, %v1382_v13 }
 0x214   : > { %v1208_v59 = vmax.f32 %v1115_v37, 0.0 }
 0x215   : > { %v1412_v38 = vpack.c.bf16 %v1383_v56, %v1370_v15  ;;  %v4333_v56 = vunpack.c.l.bf16 %v3406_v33 }
 0x216   : > { %v3540_v3 = vpack.c.bf16 %v1209_v29, %v1208_v59 }
 0x217   : > { %v1418_v6 = vunpack.c.l.bf16 %v1412_v38  ;;  %v1419_v41 = vunpack.c.h.bf16 %v1412_v38 }
 0x218   : > { %v4293_v62 = vunpack.c.l.bf16 %v3540_v3  ;;  %v1305_v23 = vunpack.c.h.bf16 %v3540_v3 }
 0x219   : > { %v1425_v55 = vmax.f32 %v3432_v26, %v1418_v6  ;;  %v4334_v26 = vunpack.c.h.bf16 %v3406_v33 }
 0x21a   : > { %v1390_v37 = vmax.f32 %v1389_v60, %v4293_v62  ;;  %v1403_v25 = vmax.f32 %v1402_v17, %v1305_v23 }
 0x21b   : > { %v1426_v60 = vmax.f32 %v1425_v55, %v1419_v41 }
 0x21c   : > { %v1391_v31 = vrot.slane %v1390_v37, 4  ;;  %v1404_v24 = vrot.slane %v1403_v25, 4 }
 0x21e   : > { %v1392_v22 = vmax.f32 %v1390_v37, %v1391_v31  ;;  %v1405_v29 = vmax.f32 %v1403_v25, %v1404_v24  ;;  %v4332_v31 = vunpack.c.h.bf16 %v3390_v27 }
 0x220   : > { %v1393_v57 = vrot.slane %v1392_v22, 2  ;;  %v1406_v59 = vrot.slane %v1405_v29, 2 }
 0x222   : > { %v1394_v47 = vmax.f32 %v1392_v22, %v1393_v57  ;;  %v1407_v9 = vmax.f32 %v1405_v29, %v1406_v59 }
 0x224   : > { %v1395_v7 = vrot.slane %v1394_v47, 1  ;;  %v1408_v20 = vrot.slane %v1407_v9, 1 }
 0x226   : > { %v1396_v52 = vmax.f32 %v1394_v47, %v1395_v7  ;;  %v1409_v43 = vmax.f32 %v1407_v9, %v1408_v20 }
 0x228   : > { %v1413_v13 = vpack.c.bf16 %v1409_v43, %v1396_v52 }
 0x22a   : > { %v1420_v17 = vunpack.c.l.bf16 %v1413_v13  ;;  %v1421_v23 = vunpack.c.h.bf16 %v1413_v13 }
 0x22c   : > { %v1427_v40 = vmax.f32 %v1426_v60, %v1420_v17 }
 0x22e   : > { %v1428_v15 = vmax.f32 %v1427_v40, %v1421_v23 }
 0x230   : > { %v1429_v25 = vsub.f32 %v1414_v5, %v1428_v15  ;;  %v1432_v24 = vsub.f32 %v4332_v31, %v1428_v15  ;;  %v1435_v37 = vsub.f32 %v4333_v56, %v1428_v15  ;;  %v1438_v22 = vsub.f32 %v4334_v26, %v1428_v15 }
 0x231   : > { %v1441_v55 = vsub.f32 %v1418_v6, %v1428_v15  ;;  %v1444_v40 = vsub.f32 %v1419_v41, %v1428_v15  ;;  %v1447_v5 = vsub.f32 %v1420_v17, %v1428_v15  ;;  %v1450_v47 = vsub.f32 %v1421_v23, %v1428_v15 }
 0x232   : > { %v1430_v20 = vmul.f32 1.442695, %v1429_v25  ;;  %v1433_v38 = vmul.f32 1.442695, %v1432_v24  ;;  %v1436_v29 = vmul.f32 1.442695, %v1435_v37 }
 0x233   : > { %v1439_v57 = vmul.f32 1.442695, %v1438_v22  ;;  %v1442_v59 = vmul.f32 1.442695, %v1441_v55  ;;  %v1445_v27 = vmul.f32 1.442695, %v1444_v40 }
 0x234   : > { %2587 = vpow2.f32 %v1430_v20  ;;  %v1448_v52 = vmul.f32 1.442695, %v1447_v5  ;;  %v1451_v13 = vmul.f32 1.442695, %v1450_v47  ;;  %v1506_v23 = vrot.slane %v3228_v18, 4 }
 0x235   : > { %2589 = vpow2.f32 %v1433_v38  ;;  %v1507_v15 = vrot.slane %v3235_v30, 4  ;;  %v1508_v22 = vrot.slane %v3242_v39, 4  ;;  %v1609_v20 = vrot.slane %v3251_v51, 4 }
 0x236   : > { %2591 = vpow2.f32 %v1436_v29  ;;  %v1509_v38 = vrot.slane %v3253_v54, 4  ;;  %v1610_v29 = vrot.slane %v3262_v11, 4  ;;  %v1510_v55 = vrot.slane %v3266_v16, 4 }
 0x237   : > { %2593 = vpow2.f32 %v1439_v57  ;;  %v1611_v40 = vrot.slane %v3271_v32, 4  ;;  %v1612_v5 = vrot.slane %v3286_v50, 4  ;;  %v3568_v47 = vunpack.c.l.bf16 %v1506_v23 }
 0x238   : > { %2595 = vpow2.f32 %v1442_v59  ;;  %v1511_v59 = vrot.slane %v3307_v14, 4  ;;  %v1526_v42 = vunpack.c.l.bf16 %v1510_v55  ;;  %v1721_v23 = vrot.slane %v3463_v61, 4 }
 0x239   : > { %2597 = vpow2.f32 %v1445_v27  ;;  %v1505_v27 = vrot.slane %v3216_v8, 4  ;;  %v1614_v55 = vrot.slane %v3329_v49, 4 }
 0x23a   : > { %v2588_v9 = vpop.eup %2587  ;;  %2599 = vpow2.f32 %v1448_v52  ;;  %v3570_v52 = vunpack.c.l.bf16 %v1507_v15  ;;  %v3584_v15 = vunpack.c.l.bf16 %v1611_v40  ;;  %v1527_v53 = vunpack.c.l.bf16 %v1511_v59 }
 0x23b   : > { %v2590_v7 = vpop.eup %2589  ;;  %2601 = vpow2.f32 %v1451_v13  ;;  %v3573_v13 = vunpack.c.l.bf16 %v1508_v22  ;;  %v3588_v22 = vunpack.c.l.bf16 %v1505_v27  ;;  %v1719_v40 = vrot.slane %v3451_v4, 4 }
 0x23c   : > { %v1453_v33 = vadd.f32 %v2590_v7, %v2588_v9  ;;  %v2592_v43 = vpop.eup %2591  ;;  %v1737_v11 = vunpack.c.l.bf16 %v1721_v23  ;;  %v1825_v27 = vrot.slane %v3526_v48, 4 }
 0x23d   : > { %v2594_v6 = vpop.eup %2593  ;;  %4337 = vst [vmem:[#allocation27_spill] sm:$0xff] %v3588_v22 }
 0x23e   : > { %v1454_v60 = vadd.f32 %v2592_v43, %v1453_v33  ;;  %v2596_v31 = vpop.eup %2595  ;;  %v1613_v33 = vrot.slane %v3312_v21, 4 }
 0x23f   : > { %v2598_v24 = vpop.eup %2597 }
 0x240   : > { %v1455_v25 = vadd.f32 %v2594_v6, %v1454_v60  ;;  %v2600_v56 = vpop.eup %2599  ;;  %v3575_v60 = vunpack.c.l.bf16 %v1609_v20  ;;  %v3591_v62 = vunpack.c.l.bf16 %v1613_v33  ;;  %v1826_v20 = vrot.slane %v3540_v3, 4 }
 0x241   : > { %v2602_v26 = vpop.eup %2601 }
 0x242   : > { %v1456_v41 = vadd.f32 %v2596_v31, %v1455_v25  ;;  %4335 = vst [vmem:[#allocation25_spill] sm:$0xff] %v3575_v60  ;;  %v1615_v25 = vrot.slane %v3349_v36, 4 }
 0x244   : > { %v1457_v17 = vadd.f32 %v2598_v24, %v1456_v41  ;;  %v1616_v41 = vrot.slane %v3366_v10, 4  ;;  %v1631_v60 = vunpack.c.l.bf16 %v1615_v25 }
 0x246   : > { %v1458_v37 = vadd.f32 %v2600_v56, %v1457_v17  ;;  %v3579_v17 = vunpack.c.l.bf16 %v1509_v38  ;;  %v1632_v51 = vunpack.c.l.bf16 %v1616_v41 }
 0x248   : > { %v1459_v57 = vadd.f32 %v2602_v26, %v1458_v37  ;;  %v3581_v37 = vunpack.c.l.bf16 %v1610_v29 }
 0x24a   : > { %2603 = vrcp.f32 %v1459_v57  ;;  %4336 = vst [vmem:[#allocation26_spill] sm:$0xff] %v3581_v37  ;;  %v3586_v57 = vunpack.c.l.bf16 %v1612_v5  ;;  %v1720_v5 = vrot.slane %v3457_v12, 4 }
 0x250   : > { %v2604_v59 = vpop.eup %2603 }
 0x251   : > { %v3601_v33 = vmul.f32 %v2604_v59, %v2588_v9  ;;  %v3603_v38 = vmul.f32 %v2604_v59, %v2590_v7  ;;  %v3605_v29 = vmul.f32 %v2604_v59, %v2592_v43  ;;  %v3607_v28 = vmul.f32 %v2604_v59, %v2594_v6 }
 0x252   : > { %v3609_v25 = vmul.f32 %v2604_v59, %v2596_v31  ;;  %v3611_v41 = vmul.f32 %v2604_v59, %v2598_v24  ;;  %v3613_v34 = vmul.f32 %v2604_v59, %v2600_v56  ;;  %v3615_v23 = vmul.f32 %v2604_v59, %v2602_v26 }
 0x253   : > { %v1474_v37 = vmul.f32 %v3601_v33, %v4338_v35  ;;  %v1535_v9 = vmul.f32 %v1527_v53, %v3603_v38  ;;  %v4339_v7 = vunpack.c.l.bf16 %v3366_v10  ;;  %v1640_v6 = vmul.f32 %v1632_v51, %v3607_v28 }
 0x254   : > { %v4340_v31 = vunpack.c.l.bf16 %v3540_v3  ;;  %v1842_v56 = vunpack.c.l.bf16 %v1826_v20  ;;  %v4341_v26 = vunpack.c.l.bf16 %v3463_v61  ;;  %v1745_v14 = vmul.f32 %v1737_v11, %v3611_v41 }
 0x255   : > { %v1570_v43 = vmul.f32 %v3605_v29, %v4339_v7  ;;  %v1736_v35 = vunpack.c.l.bf16 %v1720_v5  ;;  %v1482_v22 = vpack.c.bf16 %v1474_v37, %v1474_v37  ;;  %v1543_v53 = vpack.c.bf16 %v1535_v9, %v1535_v9 }
 0x256   : > { %v1780_v24 = vmul.f32 %v3613_v34, %v4340_v31  ;;  %v1675_v59 = vmul.f32 %v3609_v25, %v4341_v26  ;;  %v1560_v8 = vadd.f32 %v1535_v9, %v1474_v37  ;;  %v1824_v10 = vrot.slane %v3520_v45, 4 }
 0x257   : > { %v1578_v63 = vpack.c.bf16 %v1570_v43, %v1570_v43  ;;  %v1850_v51 = vmul.f32 %v1842_v56, %v3615_v23  ;;  %1490 = vst [vmem:[%s3634_s22 + $0xe0] sm:$0xf] %v1482_v22  ;;  %v1648_v3 = vpack.c.bf16 %v1640_v6, %v1640_v6  ;;  %v4342_v11 = vunpack.c.l.bf16 %v3266_v16 }
 0x258   : > { %v1788_v7 = vpack.c.bf16 %v1780_v24, %v1780_v24  ;;  %v1595_v61 = vadd.f32 %v1570_v43, %v1560_v8  ;;  %v1534_v37 = vmul.f32 %v1526_v42, %v3603_v38  ;;  %v1683_v5 = vpack.c.bf16 %v1675_v59, %v1675_v59  ;;  %1551 = vst [vmem:[%s3634_s22 + $0xe4] sm:$0xf] %v1543_v53 }
 0x259   : > { %v1473_v20 = vmul.f32 %v3601_v33, %v4342_v11  ;;  %v1639_v9 = vmul.f32 %v1631_v60, %v3607_v28  ;;  %v3644_v31 = vmul.f32 %v1736_v35, %v3611_v41  ;;  %v1841_v56 = vunpack.c.l.bf16 %v1825_v27  ;;  %1586 = vst [vmem:[%s3634_s22 + $0xe8] sm:$0xf] %v1578_v63 }
 0x25a   : > { %1796 = vst [vmem:[%s3634_s22 + $0xf8] sm:$0xf] %v1788_v7  ;;  %v1665_v8 = vadd.f32 %v1640_v6, %v1595_v61  ;;  %v1753_v22 = vpack.c.bf16 %v1745_v14, %v1745_v14  ;;  %v4343_v16 = vunpack.c.l.bf16 %v3349_v36  ;;  %v1630_v42 = vunpack.c.l.bf16 %v1614_v55 }
 0x25b   : > { %v1559_v43 = vadd.f32 %v1534_v37, %v1473_v20  ;;  %v1735_v7 = vunpack.c.l.bf16 %v1719_v40  ;;  %v1858_v11 = vpack.c.bf16 %v1850_v51, %v1850_v51  ;;  %v4344_v60 = vunpack.c.l.bf16 %v3457_v12  ;;  %1656 = vst [vmem:[%s3634_s22 + $0xec] sm:$0xf] %v1648_v3 }
 0x25c   : > { %v1569_v26 = vmul.f32 %v3605_v29, %v4343_v16  ;;  %v1700_v27 = vadd.f32 %v1675_v59, %v1665_v8  ;;  %v1481_v6 = vpack.c.bf16 %v1473_v20, %v1473_v20  ;;  %v1849_v61 = vmul.f32 %v1841_v56, %v3615_v23  ;;  %1691 = vst [vmem:[%s3634_s22 + $0xf0] sm:$0xf] %v1683_v5 }
 0x25d   : > { %v1674_v35 = vmul.f32 %v3609_v25, %v4344_v60  ;;  %v1542_v36 = vpack.c.bf16 %v1534_v37, %v1534_v37  ;;  %v4345_v16 = vunpack.c.l.bf16 %v3253_v54  ;;  %v3664_v63 = vmul.f32 %v3579_v17, %v3603_v38  ;;  %1761 = vst [vmem:[%s3634_s22 + $0xf4] sm:$0xf] %v1753_v22 }
 0x25e   : > { %v1594_v53 = vadd.f32 %v1569_v26, %v1559_v43  ;;  %v3667_v12 = vmul.f32 %v1630_v42, %v3607_v28  ;;  %v1770_v40 = vadd.f32 %v1745_v14, %v1700_v27  ;;  %v1577_v59 = vpack.c.bf16 %v1569_v26, %v1569_v26  ;;  %1866 = vst [vmem:[%s3634_s22 + $0xfc] sm:$0xf] %v1858_v11 }
 0x25f   : > { %v3660_v55 = vmul.f32 %v3601_v33, %v4345_v16  ;;  %v1840_v20 = vunpack.c.l.bf16 %v1824_v10  ;;  %v1647_v54 = vpack.c.bf16 %v1639_v9, %v1639_v9  ;;  %v4346_v37 = vunpack.c.l.bf16 %v3526_v48  ;;  %1489 = vst [vmem:[%s3634_s22 + $0xc0] sm:$0xf] %v1481_v6 }
 0x260   : > { %v1664_v3 = vadd.f32 %v1639_v9, %v1594_v53  ;;  %v4347_v56 = vunpack.c.l.bf16 %v3329_v49  ;;  %v1717_v14 = vrot.slane %v3438_v19, 4  ;;  %v1718_v10 = vrot.slane %v3447_v46, 4  ;;  %1550 = vst [vmem:[%s3634_s22 + $0xc4] sm:$0xf] %v1542_v36 }
 0x261   : > { %v1779_v5 = vmul.f32 %v3613_v34, %v4346_v37  ;;  %v1558_v17 = vadd.f32 %v3664_v63, %v3660_v55  ;;  %v1805_v22 = vadd.f32 %v1780_v24, %v1770_v40  ;;  %v1682_v48 = vpack.c.bf16 %v1674_v35, %v1674_v35  ;;  %1585 = vst [vmem:[%s3634_s22 + $0xc8] sm:$0xf] %v1577_v59 }
 0x262   : > { %v3680_v8 = vmul.f32 %v3605_v29, %v4347_v56  ;;  %v1699_v9 = vadd.f32 %v1674_v35, %v1664_v3  ;;  %v3688_v26 = vmul.f32 %v1735_v7, %v3611_v41  ;;  %v3691_v49 = vmul.f32 %v1840_v20, %v3615_v23  ;;  %1655 = vst [vmem:[%s3634_s22 + $0xcc] sm:$0xf] %v1647_v54 }
 0x263   : > { %v1875_v42 = vadd.f32 %v1850_v51, %v1805_v22  ;;  %v1752_v11 = vpack.c.bf16 %v3644_v31, %v3644_v31  ;;  %v4348_v60 = vunpack.c.l.bf16 %v3242_v39  ;;  %v1823_v27 = vrot.slane %v3512_v58, 4  ;;  %1690 = vst [vmem:[%s3634_s22 + $0xd0] sm:$0xf] %v1682_v48 }
 0x264   : > { %v1593_v43 = vadd.f32 %v3680_v8, %v1558_v17  ;;  %v1769_v24 = vadd.f32 %v3644_v31, %v1699_v9  ;;  %v1787_v7 = vpack.c.bf16 %v1779_v5, %v1779_v5  ;;  %v4349_v51 = vunpack.c.l.bf16 %v3451_v4 }
 0x265   : > { %v3700_v35 = vmul.f32 %v3601_v33, %v4348_v60  ;;  %v1734_v36 = vunpack.c.l.bf16 %v1718_v10  ;;  %1883 = vst [vmem:[%s3710_s25 + $0x38] sm:$0xff] %v1875_v42  ;;  %1973 = vmatpush.msrb.mxu0 %v1875_v42  ;;  %v1857_v31 = vpack.c.bf16 %v1849_v61, %v1849_v61  ;;  %v3715_v16 = vmul.f32 %v3573_v13, %v3603_v38 }
 0x266   : > { %v1663_v6 = vadd.f32 %v3667_v12, %v1593_v43  ;;  %v1673_v53 = vmul.f32 %v3609_v25, %v4349_v51  ;;  %v1804_v39 = vadd.f32 %v1779_v5, %v1769_v24  ;;  %v1822_v40 = vrot.slane %v3505_v2, 4  ;;  %1760 = vst [vmem:[%s3634_s22 + $0xd4] sm:$0xf] %v1752_v11 }
 0x267   : > { %v1480_v4 = vpack.c.bf16 %v3660_v55, %v3660_v55  ;;  %v3723_v3 = vmul.f32 %v3591_v62, %v3607_v28  ;;  %v1557_v54 = vadd.f32 %v3715_v16, %v3700_v35  ;;  %v4350_v13 = vunpack.c.l.bf16 %v3312_v21  ;;  %1795 = vst [vmem:[%s3634_s22 + $0xd8] sm:$0xf] %v1787_v7 }
 0x268   : > { %v1698_v59 = vadd.f32 %v1673_v53, %v1663_v6  ;;  %v1874_v20 = vadd.f32 %v1849_v61, %v1804_v39  ;;  %v3734_v5 = vmul.f32 %v1734_v36, %v3611_v41  ;;  %v1541_v62 = vpack.c.bf16 %v3664_v63, %v3664_v63  ;;  %1865 = vst [vmem:[%s3634_s22 + $0xdc] sm:$0xf] %v1857_v31 }
 0x269   : > { %v3731_v37 = vmul.f32 %v3605_v29, %v4350_v13  ;;  %v4351_v61 = vunpack.c.l.bf16 %v3520_v45  ;;  %v1839_v56 = vunpack.c.l.bf16 %v1823_v27  ;;  %v1716_v21 = vrot.slane %v3428_v1, 4  ;;  %1488 = vst [vmem:[%s3634_s22 + $0xa0] sm:$0xf] %v1480_v4 }
 0x26a   : > { %v1768_v55 = vadd.f32 %v3688_v26, %v1698_v59  ;;  %1974 = vmatpush.msrb.mxu0 %v1874_v20  ;;  %v1576_v10 = vpack.c.bf16 %v3680_v8, %v3680_v8  ;;  %v1646_v22 = vpack.c.bf16 %v3667_v12, %v3667_v12  ;;  %1882 = vst [vmem:[%s3710_s25 + $0x30] sm:$0xff] %v1874_v20  ;;  %v4352_v48 = vunpack.c.l.bf16 %v3235_v30 }
 0x26b   : > { %v1778_v17 = vmul.f32 %v3613_v34, %v4351_v61  ;;  %v1592_v63 = vadd.f32 %v3731_v37, %v1557_v54  ;;  %v3752_v45 = vmul.f32 %v1839_v56, %v3615_v23  ;;  %v3761_v42 = vmul.f32 %v3570_v52, %v3603_v38  ;;  %1549 = vst [vmem:[%s3634_s22 + $0xa4] sm:$0xf] %v1541_v62 }
 0x26c   : > { %v3757_v43 = vmul.f32 %v3601_v33, %v4352_v48  ;;  %v1681_v12 = vpack.c.bf16 %v1673_v53, %v1673_v53  ;;  %v4353_v11 = vunpack.c.l.bf16 %v3447_v46  ;;  %v3772_v30 = vmul.f32 %v3586_v57, %v3607_v28  ;;  %1584 = vst [vmem:[%s3634_s22 + $0xa8] sm:$0xf] %v1576_v10 }
 0x26d   : > { %v1803_v9 = vadd.f32 %v1778_v17, %v1768_v55  ;;  %v1662_v8 = vadd.f32 %v3723_v3, %v1592_v63  ;;  %v1733_v60 = vunpack.c.l.bf16 %v1717_v14  ;;  %v1751_v52 = vpack.c.bf16 %v3688_v26, %v3688_v26  ;;  %1654 = vst [vmem:[%s3634_s22 + $0xac] sm:$0xf] %v1646_v22 }
 0x26e   : > { %v3768_v24 = vmul.f32 %v3609_v25, %v4353_v11  ;;  %v1838_v7 = vunpack.c.l.bf16 %v1822_v40  ;;  %v1786_v6 = vpack.c.bf16 %v1778_v17, %v1778_v17  ;;  %v1556_v51 = vadd.f32 %v3761_v42, %v3757_v43  ;;  %1689 = vst [vmem:[%s3634_s22 + $0xb0] sm:$0xf] %v1681_v12  ;;  %v4360_v11 = vld [vmem:[#allocation18_spill] sm:$0xff] }
 0x26f   : > { %v1873_v27 = vadd.f32 %v3691_v49, %v1803_v9  ;;  %v4354_v57 = vunpack.c.l.bf16 %v3286_v50  ;;  %v1732_v53 = vunpack.c.l.bf16 %v1716_v21  ;;  %v1856_v26 = vpack.c.bf16 %v3691_v49, %v3691_v49  ;;  %1759 = vst [vmem:[%s3634_s22 + $0xb4] sm:$0xf] %v1751_v52 }
 0x270   : > { %v1697_v46 = vadd.f32 %v3768_v24, %v1662_v8  ;;  %v4355_v36 = vunpack.c.l.bf16 %v3512_v58  ;;  %v3794_v31 = vmul.f32 %v1733_v60, %v3611_v41  ;;  %v3800_v4 = vmul.f32 %v1838_v7, %v3615_v23  ;;  %1794 = vst [vmem:[%s3634_s22 + $0xb8] sm:$0xf] %v1786_v6  ;;  %v4363_v6 = vld [vmem:[#allocation19_spill] sm:$0xff] }
 0x271   : > { %v3785_v14 = vmul.f32 %v3605_v29, %v4354_v57  ;;  %1975 = vmatpush.msrb.mxu0 %v1873_v27  ;;  %v4356_v59 = vunpack.c.l.bf16 %v3228_v18  ;;  %v1820_v58 = vrot.slane %v3496_v44, 4  ;;  %v1821_v20 = vrot.slane %v3500_v0, 4  ;;  %1864 = vst [vmem:[%s3634_s22 + $0xbc] sm:$0xf] %v1856_v26  ;;  %v4366_v26 = vld [vmem:[#allocation26_spill] sm:$0xff] }
 0x272   : > { %v1777_v39 = vmul.f32 %v3613_v34, %v4355_v36  ;;  %v1767_v50 = vadd.f32 %v3734_v5, %v1697_v46  ;;  %v1479_v54 = vpack.c.bf16 %v3700_v35, %v3700_v35  ;;  %v3814_v13 = vmul.f32 %v3568_v47, %v3603_v38  ;;  %1881 = vst [vmem:[%s3710_s25 + $0x28] sm:$0xff] %v1873_v27 }
 0x273   : > { %v1591_v40 = vadd.f32 %v3785_v14, %v1556_v51  ;;  %v3805_v49 = vmul.f32 %v3601_v33, %v4356_v59  ;;  %v1540_v18 = vpack.c.bf16 %v3715_v16, %v3715_v16  ;;  %v4357_v61 = vunpack.c.l.bf16 %v3438_v19  ;;  %v4369_v59 = vld [vmem:[#allocation24_spill] sm:$0xff] }
 0x274   : > { %v1802_v62 = vadd.f32 %v1777_v39, %v1767_v50  ;;  %v1575_v35 = vpack.c.bf16 %v3731_v37, %v3731_v37  ;;  %v4358_v56 = vunpack.c.l.bf16 %v3271_v32  ;;  %v3837_v21 = vmul.f32 %v3584_v15, %v3607_v28  ;;  %1487 = vst [vmem:[%s3634_s22 + $0x80] sm:$0xf] %v1479_v54 }
 0x275   : > { %v1661_v55 = vadd.f32 %v3772_v30, %v1591_v40  ;;  %v3823_v17 = vmul.f32 %v3609_v25, %v4357_v61  ;;  %v1555_v47 = vadd.f32 %v3814_v13, %v3805_v49  ;;  %v1645_v19 = vpack.c.bf16 %v3723_v3, %v3723_v3  ;;  %1548 = vst [vmem:[%s3634_s22 + $0x84] sm:$0xf] %v1540_v18  ;;  %v4370_v61 = vld [vmem:[#allocation21_spill] sm:$0xff] }
 0x276   : > { %v3833_v16 = vmul.f32 %v3605_v29, %v4358_v56  ;;  %v1872_v10 = vadd.f32 %v3752_v45, %v1802_v62  ;;  %v3845_v22 = vmul.f32 %v1732_v53, %v3611_v41  ;;  %v1680_v32 = vpack.c.bf16 %v3768_v24, %v3768_v24  ;;  %1583 = vst [vmem:[%s3634_s22 + $0x88] sm:$0xf] %v1575_v35 }
 0x277   : > { %v1696_v37 = vadd.f32 %v3823_v17, %v1661_v55  ;;  %v1750_v15 = vpack.c.bf16 %v3734_v5, %v3734_v5  ;;  %v1837_v9 = vunpack.c.l.bf16 %v1821_v20  ;;  %v1785_v3 = vpack.c.bf16 %v1777_v39, %v1777_v39  ;;  %1653 = vst [vmem:[%s3634_s22 + $0x8c] sm:$0xf] %v1645_v19  ;;  %v4367_v39 = vld [vmem:[#allocation23_spill] sm:$0xff] }
 0x278   : > { %v1590_v63 = vadd.f32 %v3833_v16, %v1555_v47  ;;  %1976 = vmatpush.msrb.mxu0 %v1872_v10  ;;  %v4359_v12 = vunpack.c.l.bf16 %v3505_v2  ;;  %v4361_v60 = vrot.slane %v4360_v11, 4  ;;  %v4362_v52 = vunpack.c.l.bf16 %v3428_v1  ;;  %v4365_v1 = vld [vmem:[#allocation27_spill] sm:$0xff]  ;;  %1688 = vst [vmem:[%s3634_s22 + $0x90] sm:$0xf] %v1680_v32  ;;  %v4373_v32 = vld [vmem:[#allocation22_spill] sm:$0xff] }
 0x279   : > { %v1766_v48 = vadd.f32 %v3794_v31, %v1696_v37  ;;  %v3870_v7 = vmul.f32 %v1837_v9, %v3615_v23  ;;  %v4364_v2 = vunpack.c.l.bf16 %v4363_v6  ;;  %v1855_v51 = vpack.c.bf16 %v3752_v45, %v3752_v45  ;;  %1758 = vst [vmem:[%s3634_s22 + $0x94] sm:$0xf] %v1750_v15 }
 0x27a   : > { %v3858_v8 = vmul.f32 %v3613_v34, %v4359_v12  ;;  %v1520_v24 = vunpack.c.l.bf16 %v4361_v60  ;;  %v1660_v5 = vadd.f32 %v3837_v21, %v1590_v63  ;;  %v3867_v27 = vmul.f32 %v3609_v25, %v4362_v52  ;;  %1793 = vst [vmem:[%s3634_s22 + $0x98] sm:$0xf] %v1785_v3 }
 0x27b   : > { %v3875_v46 = vmul.f32 %v3601_v33, %v4364_v2  ;;  %v3883_v53 = vmul.f32 %v4365_v1, %v3603_v38  ;;  %v3887_v36 = vmul.f32 %v4366_v26, %v3607_v28  ;;  %v4368_v50 = vrot.slane %v4367_v39, 4  ;;  %1863 = vst [vmem:[%s3634_s22 + $0x9c] sm:$0xf] %v1855_v51 }
 0x27c   : > { %v1801_v57 = vadd.f32 %v3858_v8, %v1766_v48  ;;  %v1819_v20 = vrot.slane %v4369_v59, 4  ;;  %v1695_v54 = vadd.f32 %v3867_v27, %v1660_v5  ;;  %v1836_v45 = vunpack.c.l.bf16 %v1820_v58  ;;  %1880 = vst [vmem:[%s3710_s25 + $0x20] sm:$0xff] %v1872_v10  ;;  %v1461_v5 = vld [vmem:[%s2942_s21] sm:$0x77] }
 0x27d   : > { %v1731_v40 = vunpack.c.l.bf16 %v4368_v50  ;;  %v1478_v18 = vpack.c.bf16 %v3757_v43, %v3757_v43  ;;  %v1554_v55 = vadd.f32 %v3883_v53, %v3875_v46  ;;  %v4371_v35 = vunpack.c.l.bf16 %v4370_v61 }
 0x27e   : > { %v1871_v62 = vadd.f32 %v3800_v4, %v1801_v57  ;;  %v1539_v58 = vpack.c.bf16 %v3761_v42, %v3761_v42  ;;  %v1765_v56 = vadd.f32 %v3845_v22, %v1695_v54  ;;  %v4372_v43 = vunpack.c.l.bf16 %v3500_v0 }
 0x27f   : > { %v3903_v47 = vmul.f32 %v3605_v29, %v4371_v35  ;;  %v3915_v37 = vmul.f32 %v1731_v40, %v3611_v41  ;;  %v4374_v15 = vrot.slane %v4373_v32, 4  ;;  %v1574_v9 = vpack.c.bf16 %v3785_v14, %v3785_v14  ;;  %1486 = vst [vmem:[%s3634_s22 + $0x60] sm:$0xf] %v1478_v18 }
 0x280   : > { %v3912_v19 = vmul.f32 %v3613_v34, %v4372_v43  ;;  %1977 = vmatpush.msrb.mxu0 %v1871_v62  ;;  %v3924_v3 = vmul.f32 %v1836_v45, %v3615_v23  ;;  %v1644_v0 = vpack.c.bf16 %v3772_v30, %v3772_v30  ;;  %v4375_v12 = vunpack.c.l.bf16 %v4360_v11  ;;  %1547 = vst [vmem:[%s3634_s22 + $0x64] sm:$0xf] %v1539_v58 }
 0x281   : > { %v1730_v63 = vunpack.c.l.bf16 %v4374_v15  ;;  %v1589_v42 = vadd.f32 %v3903_v47, %v1554_v55  ;;  %v3936_v14 = vmul.f32 %v1520_v24, %v3603_v38  ;;  %v1679_v10 = vpack.c.bf16 %v3823_v17, %v3823_v17  ;;  %v4377_v17 = vld [vmem:[#allocation20_spill] sm:$0xff]  ;;  %1582 = vst [vmem:[%s3634_s22 + $0x68] sm:$0xf] %v1574_v9 }
 0x282   : > { %v1800_v48 = vadd.f32 %v3912_v19, %v1765_v56  ;;  %v3933_v60 = vmul.f32 %v3601_v33, %v4375_v12  ;;  %v4376_v30 = vunpack.c.l.bf16 %v4367_v39  ;;  %v1835_v11 = vunpack.c.l.bf16 %v1819_v20  ;;  %1652 = vst [vmem:[%s3634_s22 + $0x6c] sm:$0xf] %v1644_v0 }
 0x283   : > { %v1659_v52 = vadd.f32 %v3887_v36, %v1589_v42  ;;  %v1749_v24 = vpack.c.bf16 %v3794_v31, %v3794_v31  ;;  %v4378_v57 = vunpack.c.l.bf16 %v4377_v17  ;;  %v1784_v26 = vpack.c.bf16 %v3858_v8, %v3858_v8  ;;  %v4379_v31 = vld [vmem:[#allocation25_spill] sm:$0xff]  ;;  %1687 = vst [vmem:[%s3634_s22 + $0x70] sm:$0xf] %v1679_v10  ;;  %v1463_v42 = vld [vmem:[%s2942_s21 + $0x10] sm:$0x77] }
 0x284   : > { %v3946_v6 = vmul.f32 %v3609_v25, %v4376_v30  ;;  %v3952_v2 = vadd.f32 %v3870_v7, %v1800_v48  ;;  %v1553_v51 = vadd.f32 %v3936_v14, %v3933_v60  ;;  %v3967_v50 = vmul.f32 %v4379_v31, %v3607_v28  ;;  %1879 = vst [vmem:[%s3710_s25 + $0x18] sm:$0xff] %v1871_v62  ;;  %v1464_v30 = vld [vmem:[%s2942_s21 + $0x18] sm:$0x77] }
 0x285   : > { %v3959_v1 = vmul.f32 %v3605_v29, %v4378_v57  ;;  %v1493_v40 = vrot.slane %v1461_v5, 4  ;;  %v1854_v20 = vpack.c.bf16 %v3800_v4, %v3800_v4  ;;  %v3975_v45 = vmul.f32 %v1730_v63, %v3611_v41  ;;  %v1462_v4 = vld [vmem:[%s2942_s21 + $0x8] sm:$0x77]  ;;  %1757 = vst [vmem:[%s3634_s22 + $0x74] sm:$0xf] %v1749_v24 }
 0x286   : > { %v1694_v39 = vadd.f32 %v3946_v6, %v1659_v52  ;;  %1978 = vmatpush.msrb.mxu0 %v3952_v2  ;;  %v4380_v18 = vunpack.c.l.bf16 %v3496_v44  ;;  %v3985_v61 = vmul.f32 %v1835_v11, %v3615_v23  ;;  %v1477_v35 = vpack.c.bf16 %v3805_v49, %v3805_v49  ;;  %1792 = vst [vmem:[%s3634_s22 + $0x78] sm:$0xf] %v1784_v26 }
 0x287   : > { %v1588_v54 = vadd.f32 %v3959_v1, %v1553_v51  ;;  %v4381_v56 = vunpack.c.l.bf16 %v4373_v32  ;;  %v1466_v44 = vmul.f32 %v3601_v33, %v1461_v5  ;;  %v1538_v15 = vpack.c.bf16 %v3814_v13, %v3814_v13  ;;  %1862 = vst [vmem:[%s3634_s22 + $0x7c] sm:$0xf] %v1854_v20 }
 0x288   : > { %v1764_v8 = vadd.f32 %v3915_v37, %v1694_v39  ;;  %v3982_v55 = vmul.f32 %v3613_v34, %v4380_v18  ;;  %v1495_v9 = vmul.f32 %v1493_v40, %v3603_v38  ;;  %v1573_v49 = vpack.c.bf16 %v3833_v16, %v3833_v16  ;;  %1485 = vst [vmem:[%s3634_s22 + $0x40] sm:$0xf] %v1477_v35  ;;  %v1889_v18 = vld [vmem:[%s4242_s6 + $0x28] sm:$0xff] }
 0x289   : > { %v1658_v58 = vadd.f32 %v3967_v50, %v1588_v54  ;;  %v3995_v43 = vmul.f32 %v3609_v25, %v4381_v56  ;;  %v1598_v0 = vrot.slane %v1462_v4, 4  ;;  %v1643_v33 = vpack.c.bf16 %v3837_v21, %v3837_v21  ;;  %1546 = vst [vmem:[%s3634_s22 + $0x44] sm:$0xf] %v1538_v15  ;;  %v1938_v15 = vpop.permute.xlu0 %1937 }
 0x28a   : > { %v1799_v63 = vadd.f32 %v3982_v55, %v1764_v8  ;;  %v1552_v48 = vadd.f32 %v1495_v9, %v1466_v44  ;;  %v1562_v38 = vmul.f32 %v3605_v29, %v1462_v4  ;;  %v1678_v16 = vpack.c.bf16 %v3867_v27, %v3867_v27  ;;  %1581 = vst [vmem:[%s3634_s22 + $0x48] sm:$0xf] %v1573_v49  ;;  %v1888_v8 = vld [vmem:[%s4242_s6 + $0x20] sm:$0xff]  ;;  %v1928_v49 = vpop.permute.xlu2 %1927 }
 0x28b   : > { %v1693_v32 = vadd.f32 %v3995_v43, %v1658_v58  ;;  %v4382_v5 = vunpack.c.l.bf16 %v4369_v59  ;;  %v1748_v21 = vpack.c.bf16 %v3845_v22, %v3845_v22  ;;  %v1600_v29 = vmul.f32 %v1598_v0, %v3607_v28  ;;  %1651 = vst [vmem:[%s3634_s22 + $0x4c] sm:$0xf] %v1643_v33 }
 0x28c   : > { %v1869_v13 = vadd.f32 %v3924_v3, %v1799_v63  ;;  %v1587_v10 = vadd.f32 %v1562_v38, %v1552_v48  ;;  %v1703_v52 = vrot.slane %v1463_v42, 4  ;;  %v1783_v27 = vpack.c.bf16 %v3912_v19, %v3912_v19  ;;  %1686 = vst [vmem:[%s3634_s22 + $0x50] sm:$0xf] %v1678_v16  ;;  %v1884_v19 = vld [vmem:[%s4242_s6] sm:$0xff]  ;;  %v1933_v63 = vpop.permute.xlu1 %1932 }
 0x28d   : > { %v1763_v12 = vadd.f32 %v3975_v45, %v1693_v32  ;;  %v4020_v62 = vmul.f32 %v3613_v34, %v4382_v5  ;;  %v1853_v11 = vpack.c.bf16 %v3870_v7, %v3870_v7  ;;  %v1667_v24 = vmul.f32 %v3609_v25, %v1463_v42  ;;  %1756 = vst [vmem:[%s3634_s22 + $0x54] sm:$0xf] %v1748_v21 }
 0x28e   : > { %1979 = vmatpush.msrb.mxu0 %v1869_v13  ;;  %v1657_v22 = vadd.f32 %v1600_v29, %v1587_v10  ;;  %v1476_v51 = vpack.c.bf16 %v3875_v46, %v3875_v46  ;;  %v1705_v7 = vmul.f32 %v1703_v52, %v3611_v41  ;;  %v1808_v57 = vrot.slane %v1464_v30, 4  ;;  %1791 = vst [vmem:[%s3634_s22 + $0x58] sm:$0xf] %v1783_v27 }
 0x28f   : > { %v1798_v59 = vadd.f32 %v4020_v62, %v1763_v12  ;;  %v1537_v25 = vpack.c.bf16 %v3883_v53, %v3883_v53  ;;  %1861 = vst [vmem:[%s3634_s22 + $0x5c] sm:$0xf] %v1853_v11  ;;  %v1572_v26 = vpack.c.bf16 %v3903_v47, %v3903_v47  ;;  %v1772_v46 = vmul.f32 %v3613_v34, %v1464_v30 }
 0x290   : > { %v1692_v17 = vadd.f32 %v1667_v24, %v1657_v22  ;;  %1878 = vst [vmem:[%s3710_s25 + $0x10] sm:$0xff] %v3952_v2  ;;  %v1642_v41 = vpack.c.bf16 %v3887_v36, %v3887_v36  ;;  %v1677_v53 = vpack.c.bf16 %v3946_v6, %v3946_v6  ;;  %v1810_v47 = vmul.f32 %v1808_v57, %v3615_v23  ;;  %v1885_v23 = vld [vmem:[%s4242_s6 + $0x8] sm:$0xff]  ;;  %v2018_v57 = vld [vmem:[%s4244_s8 + $0x20] sm:$0xff] }
 0x291   : > { %v1868_v28 = vadd.f32 %v3985_v61, %v1798_v59  ;;  %1484 = vst [vmem:[%s3634_s22 + $0x20] sm:$0xf] %v1476_v51  ;;  %v1747_v34 = vpack.c.bf16 %v3915_v37, %v3915_v37  ;;  %v1782_v2 = vpack.c.bf16 %v3982_v55, %v3982_v55  ;;  %v1852_v6 = vpack.c.bf16 %v3924_v3, %v3924_v3  ;;  %v1890_v55 = vld [vmem:[%s4242_s6 + $0x30] sm:$0xff]  ;;  %v1923_v32 = vpop.permute.xlu0 %1922  ;;  %v2015_v51 = vld [vmem:[%s4244_s8 + $0x8] sm:$0xff] }
 0x292   : > { %v1762_v39 = vadd.f32 %v1705_v7, %v1692_v17  ;;  %1545 = vst [vmem:[%s3634_s22 + $0x24] sm:$0xf] %v1537_v25  ;;  %v1475_v37 = vpack.c.bf16 %v3933_v60, %v3933_v60  ;;  %v1536_v40 = vpack.c.bf16 %v3936_v14, %v3936_v14  ;;  %v1571_v3 = vpack.c.bf16 %v3959_v1, %v3959_v1  ;;  %v1886_v1 = vld [vmem:[%s4242_s6 + $0x10] sm:$0xff]  ;;  %v1913_v21 = vpop.permute.xlu2 %1912  ;;  %v2017_v7 = vld [vmem:[%s4244_s8 + $0x18] sm:$0xff]  ;;  %v2019_v25 = vld [vmem:[%s4244_s8 + $0x28] sm:$0xff] }
 0x293   : > { %1980 = vmatpush.msrb.mxu0 %v1868_v28  ;;  %1580 = vst [vmem:[%s3634_s22 + $0x28] sm:$0xf] %v1572_v26  ;;  %v1641_v20 = vpack.c.bf16 %v3967_v50, %v3967_v50  ;;  %v1676_v60 = vpack.c.bf16 %v3995_v43, %v3995_v43  ;;  %v1746_v14 = vpack.c.bf16 %v3975_v45, %v3975_v45  ;;  %v1887_v45 = vld [vmem:[%s4242_s6 + $0x18] sm:$0xff]  ;;  %v2016_v17 = vld [vmem:[%s4244_s8 + $0x10] sm:$0xff] }
 0x294   : > { %2488 = vmatmul.msk.f32.vlgmr.msrb.gmra.mxu0 %vm1940_vm3, %v1884_v19  ;;  %v1797_v31 = vadd.f32 %v1772_v46, %v1762_v39  ;;  %1650 = vst [vmem:[%s3634_s22 + $0x2c] sm:$0xf] %v1642_v41  ;;  %v1781_v54 = vpack.c.bf16 %v4020_v62, %v4020_v62  ;;  %v1851_v50 = vpack.c.bf16 %v3985_v61, %v3985_v61  ;;  %v1891_v61 = vld [vmem:[%s4242_s6 + $0x38] sm:$0xff]  ;;  %v2014_v19 = vld [vmem:[%s4244_s8] sm:$0xff]  ;;  %v2020_v26 = vld [vmem:[%s4244_s8 + $0x30] sm:$0xff] }
 0x295   : > { %1685 = vst [vmem:[%s3634_s22 + $0x30] sm:$0xf] %v1677_v53  ;;  %v2021_v39 = vld [vmem:[%s4244_s8 + $0x38] sm:$0xff] }
 0x296   : > { %v4066_v36 = vadd.f32 %v1810_v47, %v1797_v31  ;;  %1755 = vst [vmem:[%s3634_s22 + $0x34] sm:$0xf] %v1747_v34 }
 0x297   : > { %1790 = vst [vmem:[%s3634_s22 + $0x38] sm:$0xf] %v1782_v2 }
 0x298   : > { %1860 = vst [vmem:[%s3634_s22 + $0x3c] sm:$0xf] %v1852_v6 }
 0x299   : > { %1877 = vst [vmem:[%s3710_s25 + $0x8] sm:$0xff] %v1869_v13  ;;  %v1918_v13 = vpop.permute.xlu1 %1917  ;;  %v1908_v52 = vpop.permute.xlu0 %1907 }
 0x29a   : > { %1483 = vst [vmem:[%s3634_s22] sm:$0xf] %v1475_v37  ;;  %v2068_v2 = vpop.permute.xlu2 %2067 }
 0x29b   : > { %1544 = vst [vmem:[%s3634_s22 + $0x4] sm:$0xf] %v1536_v40 }
 0x29c   : > { %2489 = vmatmul.msk.f32.gmra.mxu0 %vm1940_vm3, %v1885_v23  ;;  %1579 = vst [vmem:[%s3634_s22 + $0x8] sm:$0xf] %v1571_v3 }
 0x29d   : > { %1649 = vst [vmem:[%s3634_s22 + $0xc] sm:$0xf] %v1641_v20 }
 0x29e   : > { %1684 = vst [vmem:[%s3634_s22 + $0x10] sm:$0xf] %v1676_v60 }
 0x29f   : > { %1754 = vst [vmem:[%s3634_s22 + $0x14] sm:$0xf] %v1746_v14 }
 0x2a0   : > { %1789 = vst [vmem:[%s3634_s22 + $0x18] sm:$0xf] %v1781_v54 }
 0x2a1   : > { %1859 = vst [vmem:[%s3634_s22 + $0x1c] sm:$0xf] %v1851_v50  ;;  %v1903_v30 = vpop.permute.xlu1 %1902  ;;  %v2063_v6 = vpop.permute.xlu0 %2062 }
 0x2a2   : > { %1876 = vst [vmem:[%s3710_s25] sm:$0xff] %v1868_v28  ;;  %v2053_v40 = vpop.permute.xlu2 %2052 }
 0x2a4   : > { %2490 = vmatmul.msk.f32.gmra.mxu0 %vm1940_vm3, %v1886_v1 }
 0x2a9   : > { %v2058_v37 = vpop.permute.xlu1 %2057  ;;  %v2048_v14 = vpop.permute.xlu0 %2047 }
 0x2ac   : > { %2491 = vmatmul.msk.f32.gmra.mxu0 %vm1940_vm3, %v1887_v45 }
 0x2b4   : > { %2492 = vmatmul.msk.f32.gmra.mxu0 %vm1940_vm3, %v1888_v8 }
 0x2bc   : > { %2493 = vmatmul.msk.f32.gmra.mxu0 %vm1940_vm3, %v1889_v18 }
 0x2c4   : > { %2494 = vmatmul.msk.f32.gmra.mxu0 %vm1940_vm3, %v1890_v55  ;;  %v2043_v55 = vpop.permute.xlu1 %2042 }
 0x2cc   : > { %2495 = vmatmul.msk.f32.gmra.mxu0 %vm1940_vm3, %v1891_v61 }
 0x311   : > { %v1982_v4 = vpop.f32.mrf.mxu0 }
 0x312   : > { %v1983_v11 = vadd.f32 %v1982_v4, %v1903_v30 }
 0x314   : > { %v2006_v28 = vmax.f32 %v1983_v11, 0.0 }
 0x319   : > { %v1985_v35 = vpop.f32.mrf.mxu0 }
 0x31a   : > { %v1986_v27 = vadd.f32 %v1985_v35, %v1908_v52  ;;  %v2038_v35 = vpop.permute.xlu2 %2037 }
 0x31c   : > { %v2007_v24 = vmax.f32 %v1986_v27, 0.0 }
 0x321   : > { %v1988_v58 = vpop.f32.mrf.mxu0 }
 0x322   : > { %v1989_v10 = vadd.f32 %v1988_v58, %v1913_v21 }
 0x324   : > { %v2008_v22 = vmax.f32 %v1989_v10, 0.0 }
 0x329   : > { %v1991_v56 = vpop.f32.mrf.mxu0 }
 0x32a   : > { %v1992_v5 = vadd.f32 %v1991_v56, %v1918_v13 }
 0x32c   : > { %v2009_v59 = vmax.f32 %v1992_v5, 0.0 }
 0x331   : > { %v1994_v43 = vpop.f32.mrf.mxu0 }
 0x332   : > { %v1995_v16 = vadd.f32 %v1994_v43, %v1923_v32  ;;  %v2033_v43 = vpop.permute.xlu0 %2032 }
 0x334   : > { %v2010_v29 = vmax.f32 %v1995_v16, 0.0 }
 0x339   : > { %v1997_v44 = vpop.f32.mrf.mxu0 }
 0x33a   : > { %v1998_v48 = vadd.f32 %v1997_v44, %v1928_v49  ;;  %v2143_v49 = vld [vmem:[%s4246_s10] sm:$0x1] }
 0x33c   : > { %v2011_v62 = vmax.f32 %v1998_v48, 0.0 }
 0x341   : > { %v2000_v9 = vpop.f32.mrf.mxu0 }
 0x342   : > { %v2001_v0 = vadd.f32 %v2000_v9, %v1933_v63 }
 0x344   : > { %v2012_v12 = vmax.f32 %v2001_v0, 0.0 }
 0x349   : > { %v2003_v42 = vpop.f32.mrf.mxu0 }
 0x34a   : > { %v2004_v33 = vadd.f32 %v2003_v42, %v1938_v15 }
 0x34c   : > { %v2013_v38 = vmax.f32 %v2004_v33, 0.0 }
 0x34e   : > { %2102 = vmatpush.msrb.mxu1 %v2013_v38 }
 0x350   : > { %2103 = vmatpush.msrb.mxu1 %v2012_v12 }
 0x352   : > { %2104 = vmatpush.msrb.mxu1 %v2011_v62 }
 0x354   : > { %2105 = vmatpush.msrb.mxu1 %v2010_v29 }
 0x356   : > { %2106 = vmatpush.msrb.mxu1 %v2009_v59 }
 0x358   : > { %2107 = vmatpush.msrb.mxu1 %v2008_v22 }
 0x35a   : > { %2108 = vmatpush.msrb.mxu1 %v2007_v24 }
 0x35c   : > { %2109 = vmatpush.msrb.mxu1 %v2006_v28 }
 0x35d   : > { %2496 = vmatmul.msk.f32.vlgmr.msrb.gmra.mxu1 %vm1940_vm3, %v2014_v19 }
 0x365   : > { %2497 = vmatmul.msk.f32.gmra.mxu1 %vm1940_vm3, %v2015_v51 }
 0x36d   : > { %2498 = vmatmul.msk.f32.gmra.mxu1 %vm1940_vm3, %v2016_v17 }
 0x375   : > { %2499 = vmatmul.msk.f32.gmra.mxu1 %vm1940_vm3, %v2017_v7 }
 0x37d   : > { %2500 = vmatmul.msk.f32.gmra.mxu1 %vm1940_vm3, %v2018_v57 }
 0x385   : > { %2501 = vmatmul.msk.f32.gmra.mxu1 %vm1940_vm3, %v2019_v25 }
 0x38d   : > { %2502 = vmatmul.msk.f32.gmra.mxu1 %vm1940_vm3, %v2020_v26 }
 0x395   : > { %2503 = vmatmul.msk.f32.gmra.mxu1 %vm1940_vm3, %v2021_v39 }
 0x3da   : > { %v2111_v46 = vpop.f32.mrf.mxu1 }
 0x3db   : > { %v2112_v44 = vadd.f32 %v2111_v46, %v2033_v43 }
 0x3dd   : > { %v2135_v9 = vmax.f32 %v2112_v44, 0.0 }
 0x3e2   : > { %v2114_v41 = vpop.f32.mrf.mxu1 }
 0x3e3   : > { %v2115_v58 = vadd.f32 %v2114_v41, %v2038_v35 }
 0x3e5   : > { %v2136_v63 = vmax.f32 %v2115_v58, 0.0 }
 0x3ea   : > { %v2117_v53 = vpop.f32.mrf.mxu1 }
 0x3eb   : > { %v2118_v61 = vadd.f32 %v2117_v53, %v2043_v55 }
 0x3ed   : > { %v2137_v15 = vmax.f32 %v2118_v61, 0.0 }
 0x3f2   : > { %v2120_v31 = vpop.f32.mrf.mxu1 }
 0x3f3   : > { %v2121_v8 = vadd.f32 %v2120_v31, %v2048_v14 }
 0x3f5   : > { %v2138_v56 = vmax.f32 %v2121_v8, 0.0 }
 0x3fa   : > { %v2123_v47 = vpop.f32.mrf.mxu1 }
 0x3fb   : > { %v2124_v50 = vadd.f32 %v2123_v47, %v2053_v40 }
 0x3fd   : > { %v2139_v4 = vmax.f32 %v2124_v50, 0.0 }
 0x402   : > { %v2126_v34 = vpop.f32.mrf.mxu1 }
 0x403   : > { %v2127_v54 = vadd.f32 %v2126_v34, %v2058_v37 }
 0x405   : > { %v2140_v18 = vmax.f32 %v2127_v54, 0.0 }
 0x40a   : > { %v2129_v23 = vpop.f32.mrf.mxu1 }
 0x40b   : > { %v2130_v20 = vadd.f32 %v2129_v23, %v2063_v6 }
 0x40d   : > { %v2141_v45 = vmax.f32 %v2130_v20, 0.0 }
 0x412   : > { %v2132_v3 = vpop.f32.mrf.mxu1 }
 0x413   : > { %v2133_v60 = vadd.f32 %v2132_v3, %v2068_v2 }
 0x415   : > { %v2142_v1 = vmax.f32 %v2133_v60, 0.0 }
 0x417   : > { %2162 = vmatpush.msrb.mxu2 %v2142_v1 }
 0x419   : > { %2163 = vmatpush.msrb.mxu2 %v2141_v45 }
 0x41b   : > { %2164 = vmatpush.msrb.mxu2 %v2140_v18 }
 0x41d   : > { %2165 = vmatpush.msrb.mxu2 %v2139_v4 }
 0x41f   : > { %2166 = vmatpush.msrb.mxu2 %v2138_v56 }
 0x421   : > { %2167 = vmatpush.msrb.mxu2 %v2137_v15 }
 0x423   : > { %2168 = vmatpush.msrb.mxu2 %v2136_v63 }
 0x425   : > { %2169 = vmatpush.msrb.mxu2 %v2135_v9 }
 0x426   : > { %2504 = vmatmul.msk.f32.vlgmr.msrb.gmra.mxu2 %vm1940_vm3, %v2143_v49 }
 0x427   : > { %2666 = shalt.err (!%p2663_p5)
}
 0x428   : > { %s2768_s25 = smov 128   ;;  %s2769_s21 = smov 512  }
 0x429   : > { %s2770_s30 = smov 8   ;;  %s2521_s14 = sshll.u32 %s2872_s11, 5 }
 0x42a   : > { %2525 = dma.vmem_to_hbm [thread:$0]  (%p2902_p10), %s2236_s15, 1024, %s2238_s27, %s4171_s17, %s2768_s25, %s2769_s21, %s2770_s30  }
 0x42b   : > { %s4383_s1 = sld [smem:[#allocation33_spill]]  ;;  %s2252_s19 = sshll.u32 %s3634_s22, 4  ;;  %s2253_s19 = int_to_ptr.vmem [resolvable:$true] %s2252_s19 }
 0x431   : > { %s2251_s29 = scalar_lea.hbm %s4383_s1, %s2521_s14  ;;  %s2687_s27 = scalar_lea.hbm %s4383_s1, 1024 }
 0x432   : > { %s2254_s0 = sshll.u32 %s2251_s29, 4  ;;  %s2255_s0 = int_to_ptr.hbm [resolvable:$true] %s2254_s0 }
 0x433   : > { %s2681_s20 = sshra.s32 %s2255_s0, 4  ;;  %s2682_s20 = int_to_ptr.hbm [resolvable:$true] %s2681_s20 }
 0x434   : > { %s2683_s12 = scalar_lea.hbm %s2682_s20, 256  ;;  %p2688_p1 = scmp.lt.s32.totalorder %s2682_s20, %s4383_s1 }
 0x435   : > { %p2684_p7 = scmp.ne.s32.totalorder %s2682_s20, %s2683_s12  ;;  %p2689_p12 = scmp.lt.s32.totalorder %s2687_s27, %s2683_s12 }
 0x437   : > { %p2685_p8 = pnand %p2684_p7, %p2902_p10  ;;  %p2690_p6 = por %p2689_p12, %p2688_p1 }
 0x439   : > { %p2686_p9 = pneg %p2685_p8 }
 0x43b   : > { %p2691_p13 = pnand %p2690_p6, %p2686_p9 }
 0x43d   : > { %2694 = shalt.err (!%p2691_p13)
}
 0x43e   : > { %s2771_s22 = smov 2048   ;;  %s2772_s30 = smov 32   ;;  %v2148_v32 = vpop.permute.xlu1 %2147  ;;  %vm2196_vm6 = vcmask 1042432  }
 0x43f   : > { %2526 = dma.vmem_to_hbm [thread:$0]  (%p2902_p10), %s2253_s19, 4096, %s2255_s0, %s4171_s17, %s2769_s21, %s2771_s22, %s2772_s30   ;;  %v2150_v42 = vperm.slane %v2148_v32, 0 }
 0x440   : > { %s2411_s2 = sshll.u32 %s2938_s28, 2  ;;  %s2508_s3 = sshll.u32 %s2872_s11, 2 }
 0x441   : > { %s4384_s14 = sld [smem:[#allocation32_spill]]  ;;  %s507_s24 = scalar_lea.vmem [#allocation6], %s2411_s2 }
 0x442   : > { %s2222_s29 = sshll.u32 %s507_s24, 4  ;;  %s2200_s11 = scalar_lea.sflag [#allocation5], %s2938_s28  ;;  %s2223_s29 = int_to_ptr.vmem [resolvable:$true] %s2222_s29 }
 0x447   : > { %s2220_s23 = scalar_lea.hbm %s4384_s14, %s2508_s3  ;;  %s2715_s15 = scalar_lea.hbm %s4384_s14, 16 }
 0x448   : > { %s2224_s19 = sshll.u32 %s2220_s23, 4  ;;  %s2225_s19 = int_to_ptr.hbm [resolvable:$true] %s2224_s19 }
 0x449   : > { %s2709_s0 = sshra.s32 %s2225_s19, 4  ;;  %s2710_s0 = int_to_ptr.hbm [resolvable:$true] %s2709_s0 }
 0x44a   : > { %s2711_s20 = scalar_lea.hbm %s2710_s0, 4  ;;  %p2716_p4 = scmp.lt.s32.totalorder %s2710_s0, %s4384_s14 }
 0x44b   : > { %p2712_p0 = scmp.ne.s32.totalorder %s2710_s0, %s2711_s20  ;;  %p2717_p5 = scmp.lt.s32.totalorder %s2715_s15, %s2711_s20 }
 0x44d   : > { %p2713_p2 = pnand %p2712_p0, %p2902_p10  ;;  %p2718_p7 = por %p2717_p5, %p2716_p4 }
 0x44f   : > { %p2714_p3 = pneg %p2713_p2 }
 0x451   : > { %p2719_p8 = pnand %p2718_p7, %p2714_p3 }
 0x4a9   : > { %v2171_v0 = vpop.f32.mrf.mxu2 }
 0x4aa   : > { %v2172_v33 = vadd.f32 %v2171_v0, %v2150_v42 }
 0x4ac   : > { %v2177_v13 = vand.u32 2147483647, %v2172_v33  ;;  %v2174_v27 = vmax.f32 %v2172_v33, 0.0  ;;  %vm2175_vm5 = vcmp.ne.f32.partialorder %v2172_v33, %v2172_v33 }
 0x4ae   : > { %v2178_v48 = vsub.f32 0.0, %v2177_v13 }
 0x4b0   : > { %v2179_v38 = vmul.f32 1.442695, %v2178_v48 }
 0x4b2   : > { %2605 = vpow2.f32 %v2179_v38 }
 0x4b8   : > { %v2606_v16 = vpop.eup %2605 }
 0x4b9   : > { %v2181_v12 = vadd.f32 1.0, %v2606_v16  ;;  %v2184_v5 = vmul.f32 -0.5, %v2606_v16  ;;  %v2187_v21 = vand.u32 2147483647, %v2606_v16 }
 0x4bb   : > { %2607 = vlog2.f32 %v2181_v12  ;;  %v2185_v62 = vadd.f32 1.0, %v2184_v5  ;;  %vm2188_vm4 = vcmp.lt.f32.partialorder %v2187_v21, 0.0004427343 }
 0x4bd   : > { %v2186_v52 = vmul.f32 %v2606_v16, %v2185_v62 }
 0x4c1   : > { %v2608_v10 = vpop.eup %2607 }
 0x4c2   : > { %v2183_v29 = vmul.f32 0.6931472, %v2608_v10 }
 0x4c4   : > { %v2189_v59 = vsel %vm2188_vm4, %v2186_v52, %v2183_v29 }
 0x4c5   : > { %v2190_v30 = vadd.f32 %v2189_v59, %v2174_v27 }
 0x4c7   : > { %v2191_v11 = vsel %vm2175_vm5, %v2172_v33, %v2190_v30 }
 0x4c8   : > { %v2192_v22 = vadd.f32 0.001, %v2191_v11 }
 0x4ca   : > { %v2194_v24 = vrot.slane %v2192_v22, 5 }
 0x4cc   : > { %v2197_v28 = vsel %vm2196_vm6, %v4066_v36, %v2194_v24 }
 0x4cd   : > { %2198 = vst [vmem:[%s507_s24] sm:$0xf] %v2197_v28 }
 0x4ce   : > { %2722 = shalt.err (!%p2719_p8)
}
 0x4cf   : > { %2524 = dma.vmem_to_hbm [thread:$0]  (%p2902_p10), %s2223_s29, 64, %s2225_s19, %s2200_s11  }
 0x4d0 PF: > { %s4385_s28 = sld [smem:[#allocation13_spill]]  ;;  %p2545_p9 = scmp.ge.s32.totalorder %s2765_s18, 2 }
 0x4d2   : > { %p2535_p1 = pnand %p2545_p9, %p2906_p11 }
 0x4d4   : > { %p2536_p12 = pneg %p2535_p1 }
 0x4d6   : > { %s2269_s2 = sand.u32 1, %s4385_s28  }
 0x4d7   : > { %s2270_s3 = scalar_lea.sflag [#allocation5], %s2269_s2 }
 0x4d8   : > { %2744 = dma.done.wait (%p2536_p12), %s2270_s3, 64  }
 0x4d9   : > { %2746 = vsyncadd (%p2536_p12), %s2270_s3, 4294967232  ;;  %s4387_s17 = sadd.s32 4294967294, %s2765_s18  }
 0x4da   : > { %s2279_s21 = sand.u32 1, %s4387_s17  }
 0x4db   : > { %s2280_s23 = scalar_lea.sflag [#allocation8], %s2279_s21 }
 0x4dc   : > { %2748 = dma.done.wait (%p2536_p12), %s2280_s23, 5120  }
 0x4dd   : > { %2750 = vsyncadd (%p2536_p12), %s2280_s23, 4294962176  ;;  %s4388_s18 = sld [smem:[#allocation15_spill]]  ;;  %s4391_s15 = smov %s2757_s16 }
 0x4de   : > { %s4389_s26 = sld [smem:[#allocation14_spill]] }
 0x4df   : > { %s4390_s17 = sld [smem:[#allocation16_spill]] }
 0x4e3   : > { %p33_p10 = scmp.ge.s32.totalorder %s4388_s18, 6  }
 0x4e4   : > { %s4392_s16 = smov %s4389_s26 }
 0x4e5   :  { %35 = sbr.rel (!%p33_p10) target bundleno = 14 (0xe), region = 148 }
 0x4ea   :  { %2296 = vsyncpa [#allocation4], 1 }
 0x4eb   :  { %2298 = vsyncpa [#allocation4 + $0x1], 1 }
 0x4ec   :  { %2299 = vsyncpa [#allocation5], 1 }
 0x4ed   :  { %2301 = vsyncpa [#allocation5 + $0x1], 1 }
 0x4ee   :  { %2302 = vsyncpa [#allocation8], 1 }
 0x4ef   :  { %2304 = vsyncpa [#allocation8 + $0x1], 1 }

</bundles_post_ra>
